<compile_context>
chip_gen: v6e
topology: v6e:2x2x1
jax: 0.10.0
libtpu: 0.0.40
codegen_flags: <defaults>
</compile_context>

<pallas_src>
import functools

import jax
import jax.numpy as jnp
from jax.experimental import pallas as pl
from jax.experimental.pallas import tpu as pltpu


def _round_up(x, m):
    return (x + m - 1) // m * m


# ----------------------------------------------------------------------------- kernels


def conv_relu_stats_kernel(m_true, p_ref, w_ref, b_ref, y_ref, stats_ref):
    """One M-tile of: y = relu(patches @ W + b); also emit per-tile BN partial sums.

    p_ref:    (TILE_M, Kpad)   bf16 im2col patch rows (zero-padded rows/cols)
    w_ref:    (Kpad, Cout)     bf16 conv weight, rows ordered (kh, kw, Cin)
    b_ref:    (1, Cout)        f32 conv bias
    y_ref:    (TILE_M, Cout)   f32 pre-BN activations
    stats_ref:(1, 2, Cout)     f32 [sum, sum_sq] over the *valid* rows of this tile
    """
    i = pl.program_id(0)
    tile_m = p_ref.shape[0]

    y = jnp.dot(p_ref[...], w_ref[...], preferred_element_type=jnp.float32)
    y = jnp.maximum(y + b_ref[...], 0.0)          # conv bias + ReLU (f32)
    y_ref[...] = y

    # Mask out rows that are padding of the global M dimension so BN statistics are
    # computed over exactly the B*Ho*Wo valid rows.
    rows = jax.lax.broadcasted_iota(jnp.int32, y.shape, 0) + i * tile_m
    ym = jnp.where(rows < m_true, y, 0.0)
    s = jnp.sum(ym, axis=0, keepdims=True)        # (1, Cout)
    ss = jnp.sum(ym * ym, axis=0, keepdims=True)  # (1, Cout)
    stats_ref[0] = jnp.concatenate([s, ss], axis=0)


def linear_kernel(x_ref, w_ref, b_ref, o_ref):
    o_ref[...] = jnp.dot(x_ref[...], w_ref[...],
                         preferred_element_type=jnp.float32) + b_ref[...]


# ------------------------------------------------------------------------ pallas calls


def _conv_relu_stats(patches, wmat, bias, m_true, tile_m):
    m_pad, kpad = patches.shape
    cout = wmat.shape[1]
    n_tiles = m_pad // tile_m
    kern = functools.partial(conv_relu_stats_kernel, m_true)
    return pl.pallas_call(
        kern,
        out_shape=(jax.ShapeDtypeStruct((m_pad, cout), jnp.float32),
                   jax.ShapeDtypeStruct((n_tiles, 2, cout), jnp.float32)),
        grid=(n_tiles,),
        in_specs=[
            pl.BlockSpec((tile_m, kpad), lambda i: (i, 0)),   # patch row tile
            pl.BlockSpec((kpad, cout), lambda i: (0, 0)),     # weights (grid-invariant)
            pl.BlockSpec((1, cout), lambda i: (0, 0)),        # bias
        ],
        out_specs=(pl.BlockSpec((tile_m, cout), lambda i: (i, 0)),
                   pl.BlockSpec((1, 2, cout), lambda i: (i, 0, 0))),
        compiler_params=pltpu.CompilerParams(
            dimension_semantics=("parallel",)),   # independent tiles -> megacore OK
    )(patches, wmat, bias)


def _linear(x, w, b, tile_b):
    b_pad, nfeat = x.shape
    k = w.shape[1]
    n_tiles = b_pad // tile_b
    return pl.pallas_call(
        linear_kernel,
        out_shape=jax.ShapeDtypeStruct((b_pad, k), jnp.float32),
        grid=(n_tiles,),
        in_specs=[
            pl.BlockSpec((tile_b, nfeat), lambda i: (i, 0)),
            pl.BlockSpec((nfeat, k), lambda i: (0, 0)),
            pl.BlockSpec((1, k), lambda i: (0, 0)),
        ],
        out_specs=pl.BlockSpec((tile_b, k), lambda i: (i, 0)),
        compiler_params=pltpu.CompilerParams(
            dimension_semantics=("parallel",)),
    )(x, w, b)


# --------------------------------------------------------------------------- JAX glue


def _im2col(x, k, stride, pad):
    """x: (B, H, W, C) -> (B*Ho*Wo, k*k*C) patch matrix, cols ordered (kh, kw, C)."""
    b_, h, w_, c = x.shape
    if pad > 0:
        x = jnp.pad(x, ((0, 0), (pad, pad), (pad, pad), (0, 0)))
    ho = (h + 2 * pad - k) // stride + 1
    wo = (w_ + 2 * pad - k) // stride + 1
    cols = []
    for di in range(k):
        for dj in range(k):
            cols.append(x[:, di:di + stride * ho:stride,
                          dj:dj + stride * wo:stride, :])
    p = jnp.stack(cols, axis=3)                       # (B, Ho, Wo, k*k, C)
    return p.reshape(b_ * ho * wo, k * k * c), ho, wo


def init_params(key, K, D, n_channels, img_size):
    chans = [D, n_channels, 2 * n_channels, 4 * n_channels, 8 * n_channels]
    ksizes = [5, 5, 5, 2]
    n_feat = (img_size // 16) ** 2 * (8 * n_channels)
    params = {}
    for i in range(4):
        key, k1, k2, k3, k4 = jax.random.split(key, 5)
        cin, cout, kk = chans[i], chans[i + 1], ksizes[i]
        params[f"conv{i}"] = (
            0.1 * jax.random.normal(k1, (kk, kk, cin, cout), jnp.float32),  # W (HWIO)
            0.1 * jax.random.normal(k2, (cout,), jnp.float32),              # conv b
            1.0 + 0.1 * jax.random.normal(k3, (cout,), jnp.float32),        # BN gamma
            0.1 * jax.random.normal(k4, (cout,), jnp.float32),              # BN beta
        )
    key, k1, k2 = jax.random.split(key, 3)
    # Linear weight rows are stored in NHWC (H, W, C) flatten order so no feature-map
    # transpose is needed before the matmul (one-time permutation of a (C,H,W)-order
    # PyTorch weight when porting real checkpoints).
    params["linear"] = (
        0.1 * jax.random.normal(k1, (n_feat, K), jnp.float32),
        0.1 * jax.random.normal(k2, (K,), jnp.float32),
    )
    return params


CONV_CFG = [(5, 2, 2), (5, 2, 2), (5, 2, 2), (2, 2, 0)]   # (kernel, stride, pad)
BN_EPS = 1e-5


def cnn_encoder_forward(x, params, img_size):
    S, M_, N, D = x.shape
    assert N == img_size * img_size
    B = S * M_
    # 's m (h w) d -> (s m) h w d'  (NHWC carrier for the module's NCHW rearrange)
    h = x.reshape(B, img_size, img_size, D).astype(jnp.float32)

    for i, (k, s, p) in enumerate(CONV_CFG):
        w, bconv, gamma, beta = params[f"conv{i}"]
        cout = w.shape[-1]

        patches, ho, wo = _im2col(h, k, s, p)
        m_true, kdim = patches.shape
        kpad = _round_up(kdim, 128)                 # lane-aligned contraction dim
        tile_m = min(512, _round_up(m_true, 16))    # row tile (multiple of 16 for bf16)
        m_padded = _round_up(m_true, tile_m)

        patches = jnp.pad(patches, ((0, m_padded - m_true), (0, kpad - kdim)))
        patches = patches.astype(jnp.bfloat16)                       # halve HBM bytes
        wmat = jnp.pad(w.reshape(-1, cout),
                       ((0, kpad - kdim), (0, 0))).astype(jnp.bfloat16)

        y, stats = _conv_relu_stats(patches, wmat, bconv.reshape(1, -1),
                                    m_true, tile_m)

        # BatchNorm2d (training-mode batch stats) folded to a per-channel affine.
        # Applied in JAX so XLA fuses it into the next layer's im2col / the flatten,
        # avoiding an extra HBM round trip and keeping zero-pad border semantics exact.
        ssum = jnp.sum(stats[:, 0, :], axis=0)
        ssq = jnp.sum(stats[:, 1, :], axis=0)
        mean = ssum / m_true
        var = jnp.maximum(ssq / m_true - mean * mean, 0.0)   # biased variance
        scale = gamma * jax.lax.rsqrt(var + BN_EPS)
        shift = beta - mean * scale
        y = y[:m_true] * scale + shift
        h = y.reshape(B, ho, wo, cout)

    # Flatten directly in NHWC order (linear weight rows already permuted to match).
    feat = h.reshape(B, -1)
    wl, bl = params["linear"]
    tile_b = min(256, _round_up(B, 16))
    b_padded = _round_up(B, tile_b)
    feat = jnp.pad(feat, ((0, b_padded - B), (0, 0))).astype(jnp.bfloat16)
    out = _linear(feat, wl.astype(jnp.bfloat16), bl.reshape(1, -1), tile_b)
    return out[:B].reshape(S, M_, -1)


def reference_forward(x, params, img_size):
    """Pure-JAX f32 reference (same NHWC weight layout) for correctness checking."""
    S, M_, N, D = x.shape
    B = S * M_
    h = x.reshape(B, img_size, img_size, D).astype(jnp.float32)
    for i, (k, s, p) in enumerate(CONV_CFG):
        w, bconv, gamma, beta = params[f"conv{i}"]
        y = jax.lax.conv_general_dilated(
            h, w, window_strides=(s, s), padding=[(p, p), (p, p)],
            dimension_numbers=("NHWC", "HWIO", "NHWC"))
        y = jnp.maximum(y + bconv, 0.0)
        mean = jnp.mean(y, axis=(0, 1, 2))
        var = jnp.mean(jnp.square(y - mean), axis=(0, 1, 2))   # biased variance
        h = (y - mean) * jax.lax.rsqrt(var + BN_EPS) * gamma + beta
    feat = h.reshape(B, -1)
    wl, bl = params["linear"]
    out = feat @ wl + bl
    return out.reshape(S, M_, -1)


if __name__ == "__main__":
    # Small shapes consistent with the module: img_size must be a multiple of 16.
    S, M, D, n_channels, K = 2, 3, 4, 4, 8
    img_size = 16
    N = img_size * img_size                # 256

    key = jax.random.PRNGKey(0)
    key, kx = jax.random.split(key)
    x = jax.random.normal(kx, (S, M, N, D), jnp.float32)
    params = init_params(key, K, D, n_channels, img_size)

    fwd = jax.jit(functools.partial(cnn_encoder_forward, img_size=img_size))
    out = jax.block_until_ready(fwd(x, params))
    assert out.shape == (S, M, K), out.shape
    assert bool(jnp.all(jnp.isfinite(out)))

    # Cross-check against a pure-JAX f32 reference (bf16 MXU operands => loose tol).
    ref = jax.block_until_ready(reference_forward(x, params, img_size))
    max_err = float(jnp.max(jnp.abs(out - ref)))
    assert max_err < 1e-1, f"mismatch vs reference: max |diff| = {max_err}"

    print("KERNEL_OK")
</pallas_src>

<mosaic_0001>
module attributes {stable_mosaic.version = 11 : i64} {
  func.func @conv_relu_stats_kernel(%arg0: i32, %arg1: memref<384x128xbf16, #tpu.memory_space<vmem>>, %arg2: memref<128x4xbf16, #tpu.memory_space<vmem>>, %arg3: memref<1x4xf32, #tpu.memory_space<vmem>>, %arg4: memref<384x4xf32, #tpu.memory_space<vmem>>, %arg5: memref<1x2x4xf32, #tpu.memory_space<vmem>>) attributes {dimension_semantics = [#tpu.dimension_semantics<parallel>], iteration_bounds = array<i64: 1>, scalar_prefetch = 0 : i64, scratch_operands = 0 : i64, tpu.core_type = #tpu.core_type<tc>, window_params = [{transform_indices = @transform_0, window_bounds = array<i64: 384, 128>}, {pipeline_mode = #tpu.pipeline_mode<synchronous>, transform_indices = @transform_1, window_bounds = array<i64: 128, 4>}, {pipeline_mode = #tpu.pipeline_mode<synchronous>, transform_indices = @transform_2, window_bounds = array<i64: 1, 4>}, {transform_indices = @transform_3, window_bounds = array<i64: 384, 4>}, {transform_indices = @transform_4, window_bounds = array<i64: 1, 2, 4>}]} {
    %c0 = arith.constant 0 : index
    %c0_0 = arith.constant 0 : index
    %0 = vector.load %arg1[%c0, %c0_0] : memref<384x128xbf16, #tpu.memory_space<vmem>>, vector<384x128xbf16>
    %c0_1 = arith.constant 0 : index
    %c0_2 = arith.constant 0 : index
    %1 = vector.load %arg2[%c0_1, %c0_2] : memref<128x4xbf16, #tpu.memory_space<vmem>>, vector<128x4xbf16>
    %cst = arith.constant dense<0.000000e+00> : vector<384x4xf32>
    %2 = tpu.matmul %0, %1, %cst {dimension_numbers = #tpu.dot_dimension_numbers<[1], [0], [0], [1], [0, 0, 1, 1], [], []>} : vector<384x128xbf16>, vector<128x4xbf16>, vector<384x4xf32> -> vector<384x4xf32>
    %c0_3 = arith.constant 0 : index
    %c0_4 = arith.constant 0 : index
    %3 = vector.load %arg3[%c0_3, %c0_4] : memref<1x4xf32, #tpu.memory_space<vmem>>, vector<1x4xf32>
    %4 = vector.broadcast %3 : vector<1x4xf32> to vector<384x4xf32>
    %5 = arith.addf %2, %4 : vector<384x4xf32>
    %cst_5 = arith.constant 0.000000e+00 : f32
    %6 = vector.broadcast %cst_5 : f32 to vector<384x4xf32>
    %7 = arith.maximumf %5, %6 : vector<384x4xf32>
    %c0_6 = arith.constant 0 : index
    %c0_7 = arith.constant 0 : index
    %8 = vector.load %arg4[%c0_6, %c0_7] : memref<384x4xf32, #tpu.memory_space<vmem>>, vector<384x4xf32>
    tpu.vector_store %arg4[%c0_6, %c0_7], %7 {strides = array<i32>} : memref<384x4xf32, #tpu.memory_space<vmem>>, vector<384x4xf32>,
    %9 = tpu.iota {dimensions = array<i32: 0>} : vector<384x4xi32>
    %c384_i32 = arith.constant 384 : i32
    %10 = arith.muli %arg0, %c384_i32 : i32
    %11 = vector.broadcast %10 : i32 to vector<384x4xi32>
    %12 = arith.addi %9, %11 : vector<384x4xi32>
    %c384_i32_8 = arith.constant 384 : i32
    %13 = vector.broadcast %c384_i32_8 : i32 to vector<384x4xi32>
    %14 = arith.cmpi slt, %12, %13 : vector<384x4xi32>
    %cst_9 = arith.constant 0.000000e+00 : f32
    %15 = vector.broadcast %cst_9 : f32 to vector<384x4xf32>
    %16 = arith.select %14, %7, %15 : vector<384x4xi1>, vector<384x4xf32>
    %cst_10 = arith.constant dense<0.000000e+00> : vector<4xf32>
    %17 = vector.multi_reduction <add>, %16, %cst_10 [0] : vector<384x4xf32> to vector<4xf32>
    %18 = vector.shape_cast %17 : vector<4xf32> to vector<1x4xf32>
    %19 = arith.mulf %16, %16 : vector<384x4xf32>
    %cst_11 = arith.constant dense<0.000000e+00> : vector<4xf32>
    %20 = vector.multi_reduction <add>, %19, %cst_11 [0] : vector<384x4xf32> to vector<4xf32>
    %21 = vector.shape_cast %20 : vector<4xf32> to vector<1x4xf32>
    %22 = tpu.concatenate %18, %21 in 0 : vector<1x4xf32>, vector<1x4xf32> -> vector<2x4xf32>
    %c0_12 = arith.constant 0 : index
    %c0_13 = arith.constant 0 : index
    %c0_14 = arith.constant 0 : index
    %23 = vector.load %arg5[%c0_12, %c0_13, %c0_14] : memref<1x2x4xf32, #tpu.memory_space<vmem>>, vector<1x2x4xf32>
    %24 = vector.shape_cast %23 : vector<1x2x4xf32> to vector<2x4xf32>
    %25 = vector.shape_cast %22 : vector<2x4xf32> to vector<1x2x4xf32>
    tpu.vector_store %arg5[%c0_12, %c0_13, %c0_14], %25 {strides = array<i32>} : memref<1x2x4xf32, #tpu.memory_space<vmem>>, vector<1x2x4xf32>,
    return
  }
  func.func @transform_0(%arg0: i32) -> (i32, i32) {
    %c0_i32 = arith.constant 0 : i32
    %c0_i32_0 = arith.constant 0 : i32
    return %arg0, %c0_i32 : i32, i32
  }
  func.func @transform_1(%arg0: i32) -> (i32, i32) {
    %c0_i32 = arith.constant 0 : i32
    %c0_i32_0 = arith.constant 0 : i32
    %c0_i32_1 = arith.constant 0 : i32
    return %c0_i32, %c0_i32_0 : i32, i32
  }
  func.func @transform_2(%arg0: i32) -> (i32, i32) {
    %c0_i32 = arith.constant 0 : i32
    %c0_i32_0 = arith.constant 0 : i32
    %c0_i32_1 = arith.constant 0 : i32
    return %c0_i32, %c0_i32_0 : i32, i32
  }
  func.func @transform_3(%arg0: i32) -> (i32, i32) {
    %c0_i32 = arith.constant 0 : i32
    %c0_i32_0 = arith.constant 0 : i32
    return %arg0, %c0_i32 : i32, i32
  }
  func.func @transform_4(%arg0: i32) -> (i32, i32, i32) {
    %c0_i32 = arith.constant 0 : i32
    %c0_i32_0 = arith.constant 0 : i32
    %c0_i32_1 = arith.constant 0 : i32
    return %arg0, %c0_i32, %c0_i32_0 : i32, i32, i32
  }
}

module attributes {stable_mosaic.version = 11 : i64} {
  func.func @conv_relu_stats_kernel(%arg0: i32, %arg1: memref<96x128xbf16, #tpu.memory_space<vmem>>, %arg2: memref<128x8xbf16, #tpu.memory_space<vmem>>, %arg3: memref<1x8xf32, #tpu.memory_space<vmem>>, %arg4: memref<96x8xf32, #tpu.memory_space<vmem>>, %arg5: memref<1x2x8xf32, #tpu.memory_space<vmem>>) attributes {dimension_semantics = [#tpu.dimension_semantics<parallel>], iteration_bounds = array<i64: 1>, scalar_prefetch = 0 : i64, scratch_operands = 0 : i64, tpu.core_type = #tpu.core_type<tc>, window_params = [{transform_indices = @transform_0, window_bounds = array<i64: 96, 128>}, {pipeline_mode = #tpu.pipeline_mode<synchronous>, transform_indices = @transform_1, window_bounds = array<i64: 128, 8>}, {pipeline_mode = #tpu.pipeline_mode<synchronous>, transform_indices = @transform_2, window_bounds = array<i64: 1, 8>}, {transform_indices = @transform_3, window_bounds = array<i64: 96, 8>}, {transform_indices = @transform_4, window_bounds = array<i64: 1, 2, 8>}]} {
    %c0 = arith.constant 0 : index
    %c0_0 = arith.constant 0 : index
    %0 = vector.load %arg1[%c0, %c0_0] : memref<96x128xbf16, #tpu.memory_space<vmem>>, vector<96x128xbf16>
    %c0_1 = arith.constant 0 : index
    %c0_2 = arith.constant 0 : index
    %1 = vector.load %arg2[%c0_1, %c0_2] : memref<128x8xbf16, #tpu.memory_space<vmem>>, vector<128x8xbf16>
    %cst = arith.constant dense<0.000000e+00> : vector<96x8xf32>
    %2 = tpu.matmul %0, %1, %cst {dimension_numbers = #tpu.dot_dimension_numbers<[1], [0], [0], [1], [0, 0, 1, 1], [], []>} : vector<96x128xbf16>, vector<128x8xbf16>, vector<96x8xf32> -> vector<96x8xf32>
    %c0_3 = arith.constant 0 : index
    %c0_4 = arith.constant 0 : index
    %3 = vector.load %arg3[%c0_3, %c0_4] : memref<1x8xf32, #tpu.memory_space<vmem>>, vector<1x8xf32>
    %4 = vector.broadcast %3 : vector<1x8xf32> to vector<96x8xf32>
    %5 = arith.addf %2, %4 : vector<96x8xf32>
    %cst_5 = arith.constant 0.000000e+00 : f32
    %6 = vector.broadcast %cst_5 : f32 to vector<96x8xf32>
    %7 = arith.maximumf %5, %6 : vector<96x8xf32>
    %c0_6 = arith.constant 0 : index
    %c0_7 = arith.constant 0 : index
    %8 = vector.load %arg4[%c0_6, %c0_7] : memref<96x8xf32, #tpu.memory_space<vmem>>, vector<96x8xf32>
    tpu.vector_store %arg4[%c0_6, %c0_7], %7 {strides = array<i32>} : memref<96x8xf32, #tpu.memory_space<vmem>>, vector<96x8xf32>,
    %9 = tpu.iota {dimensions = array<i32: 0>} : vector<96x8xi32>
    %c96_i32 = arith.constant 96 : i32
    %10 = arith.muli %arg0, %c96_i32 : i32
    %11 = vector.broadcast %10 : i32 to vector<96x8xi32>
    %12 = arith.addi %9, %11 : vector<96x8xi32>
    %c96_i32_8 = arith.constant 96 : i32
    %13 = vector.broadcast %c96_i32_8 : i32 to vector<96x8xi32>
    %14 = arith.cmpi slt, %12, %13 : vector<96x8xi32>
    %cst_9 = arith.constant 0.000000e+00 : f32
    %15 = vector.broadcast %cst_9 : f32 to vector<96x8xf32>
    %16 = arith.select %14, %7, %15 : vector<96x8xi1>, vector<96x8xf32>
    %cst_10 = arith.constant dense<0.000000e+00> : vector<8xf32>
    %17 = vector.multi_reduction <add>, %16, %cst_10 [0] : vector<96x8xf32> to vector<8xf32>
    %18 = vector.shape_cast %17 : vector<8xf32> to vector<1x8xf32>
    %19 = arith.mulf %16, %16 : vector<96x8xf32>
    %cst_11 = arith.constant dense<0.000000e+00> : vector<8xf32>
    %20 = vector.multi_reduction <add>, %19, %cst_11 [0] : vector<96x8xf32> to vector<8xf32>
    %21 = vector.shape_cast %20 : vector<8xf32> to vector<1x8xf32>
    %22 = tpu.concatenate %18, %21 in 0 : vector<1x8xf32>, vector<1x8xf32> -> vector<2x8xf32>
    %c0_12 = arith.constant 0 : index
    %c0_13 = arith.constant 0 : index
    %c0_14 = arith.constant 0 : index
    %23 = vector.load %arg5[%c0_12, %c0_13, %c0_14] : memref<1x2x8xf32, #tpu.memory_space<vmem>>, vector<1x2x8xf32>
    %24 = vector.shape_cast %23 : vector<1x2x8xf32> to vector<2x8xf32>
    %25 = vector.shape_cast %22 : vector<2x8xf32> to vector<1x2x8xf32>
    tpu.vector_store %arg5[%c0_12, %c0_13, %c0_14], %25 {strides = array<i32>} : memref<1x2x8xf32, #tpu.memory_space<vmem>>, vector<1x2x8xf32>,
    return
  }
  func.func @transform_0(%arg0: i32) -> (i32, i32) {
    %c0_i32 = arith.constant 0 : i32
    %c0_i32_0 = arith.constant 0 : i32
    return %arg0, %c0_i32 : i32, i32
  }
  func.func @transform_1(%arg0: i32) -> (i32, i32) {
    %c0_i32 = arith.constant 0 : i32
    %c0_i32_0 = arith.constant 0 : i32
    %c0_i32_1 = arith.constant 0 : i32
    return %c0_i32, %c0_i32_0 : i32, i32
  }
  func.func @transform_2(%arg0: i32) -> (i32, i32) {
    %c0_i32 = arith.constant 0 : i32
    %c0_i32_0 = arith.constant 0 : i32
    %c0_i32_1 = arith.constant 0 : i32
    return %c0_i32, %c0_i32_0 : i32, i32
  }
  func.func @transform_3(%arg0: i32) -> (i32, i32) {
    %c0_i32 = arith.constant 0 : i32
    %c0_i32_0 = arith.constant 0 : i32
    return %arg0, %c0_i32 : i32, i32
  }
  func.func @transform_4(%arg0: i32) -> (i32, i32, i32) {
    %c0_i32 = arith.constant 0 : i32
    %c0_i32_0 = arith.constant 0 : i32
    %c0_i32_1 = arith.constant 0 : i32
    return %arg0, %c0_i32, %c0_i32_0 : i32, i32, i32
  }
}

module attributes {stable_mosaic.version = 11 : i64} {
  func.func @conv_relu_stats_kernel(%arg0: i32, %arg1: memref<32x256xbf16, #tpu.memory_space<vmem>>, %arg2: memref<256x16xbf16, #tpu.memory_space<vmem>>, %arg3: memref<1x16xf32, #tpu.memory_space<vmem>>, %arg4: memref<32x16xf32, #tpu.memory_space<vmem>>, %arg5: memref<1x2x16xf32, #tpu.memory_space<vmem>>) attributes {dimension_semantics = [#tpu.dimension_semantics<parallel>], iteration_bounds = array<i64: 1>, scalar_prefetch = 0 : i64, scratch_operands = 0 : i64, tpu.core_type = #tpu.core_type<tc>, window_params = [{transform_indices = @transform_0, window_bounds = array<i64: 32, 256>}, {pipeline_mode = #tpu.pipeline_mode<synchronous>, transform_indices = @transform_1, window_bounds = array<i64: 256, 16>}, {pipeline_mode = #tpu.pipeline_mode<synchronous>, transform_indices = @transform_2, window_bounds = array<i64: 1, 16>}, {transform_indices = @transform_3, window_bounds = array<i64: 32, 16>}, {transform_indices = @transform_4, window_bounds = array<i64: 1, 2, 16>}]} {
    %c0 = arith.constant 0 : index
    %c0_0 = arith.constant 0 : index
    %0 = vector.load %arg1[%c0, %c0_0] : memref<32x256xbf16, #tpu.memory_space<vmem>>, vector<32x256xbf16>
    %c0_1 = arith.constant 0 : index
    %c0_2 = arith.constant 0 : index
    %1 = vector.load %arg2[%c0_1, %c0_2] : memref<256x16xbf16, #tpu.memory_space<vmem>>, vector<256x16xbf16>
    %cst = arith.constant dense<0.000000e+00> : vector<32x16xf32>
    %2 = tpu.matmul %0, %1, %cst {dimension_numbers = #tpu.dot_dimension_numbers<[1], [0], [0], [1], [0, 0, 1, 1], [], []>} : vector<32x256xbf16>, vector<256x16xbf16>, vector<32x16xf32> -> vector<32x16xf32>
    %c0_3 = arith.constant 0 : index
    %c0_4 = arith.constant 0 : index
    %3 = vector.load %arg3[%c0_3, %c0_4] : memref<1x16xf32, #tpu.memory_space<vmem>>, vector<1x16xf32>
    %4 = vector.broadcast %3 : vector<1x16xf32> to vector<32x16xf32>
    %5 = arith.addf %2, %4 : vector<32x16xf32>
    %cst_5 = arith.constant 0.000000e+00 : f32
    %6 = vector.broadcast %cst_5 : f32 to vector<32x16xf32>
    %7 = arith.maximumf %5, %6 : vector<32x16xf32>
    %c0_6 = arith.constant 0 : index
    %c0_7 = arith.constant 0 : index
    %8 = vector.load %arg4[%c0_6, %c0_7] : memref<32x16xf32, #tpu.memory_space<vmem>>, vector<32x16xf32>
    tpu.vector_store %arg4[%c0_6, %c0_7], %7 {strides = array<i32>} : memref<32x16xf32, #tpu.memory_space<vmem>>, vector<32x16xf32>,
    %9 = tpu.iota {dimensions = array<i32: 0>} : vector<32x16xi32>
    %c32_i32 = arith.constant 32 : i32
    %10 = arith.muli %arg0, %c32_i32 : i32
    %11 = vector.broadcast %10 : i32 to vector<32x16xi32>
    %12 = arith.addi %9, %11 : vector<32x16xi32>
    %c24_i32 = arith.constant 24 : i32
    %13 = vector.broadcast %c24_i32 : i32 to vector<32x16xi32>
    %14 = arith.cmpi slt, %12, %13 : vector<32x16xi32>
    %cst_8 = arith.constant 0.000000e+00 : f32
    %15 = vector.broadcast %cst_8 : f32 to vector<32x16xf32>
    %16 = arith.select %14, %7, %15 : vector<32x16xi1>, vector<32x16xf32>
    %cst_9 = arith.constant dense<0.000000e+00> : vector<16xf32>
    %17 = vector.multi_reduction <add>, %16, %cst_9 [0] : vector<32x16xf32> to vector<16xf32>
    %18 = vector.shape_cast %17 : vector<16xf32> to vector<1x16xf32>
    %19 = arith.mulf %16, %16 : vector<32x16xf32>
    %cst_10 = arith.constant dense<0.000000e+00> : vector<16xf32>
    %20 = vector.multi_reduction <add>, %19, %cst_10 [0] : vector<32x16xf32> to vector<16xf32>
    %21 = vector.shape_cast %20 : vector<16xf32> to vector<1x16xf32>
    %22 = tpu.concatenate %18, %21 in 0 : vector<1x16xf32>, vector<1x16xf32> -> vector<2x16xf32>
    %c0_11 = arith.constant 0 : index
    %c0_12 = arith.constant 0 : index
    %c0_13 = arith.constant 0 : index
    %23 = vector.load %arg5[%c0_11, %c0_12, %c0_13] : memref<1x2x16xf32, #tpu.memory_space<vmem>>, vector<1x2x16xf32>
    %24 = vector.shape_cast %23 : vector<1x2x16xf32> to vector<2x16xf32>
    %25 = vector.shape_cast %22 : vector<2x16xf32> to vector<1x2x16xf32>
    tpu.vector_store %arg5[%c0_11, %c0_12, %c0_13], %25 {strides = array<i32>} : memref<1x2x16xf32, #tpu.memory_space<vmem>>, vector<1x2x16xf32>,
    return
  }
  func.func @transform_0(%arg0: i32) -> (i32, i32) {
    %c0_i32 = arith.constant 0 : i32
    %c0_i32_0 = arith.constant 0 : i32
    return %arg0, %c0_i32 : i32, i32
  }
  func.func @transform_1(%arg0: i32) -> (i32, i32) {
    %c0_i32 = arith.constant 0 : i32
    %c0_i32_0 = arith.constant 0 : i32
    %c0_i32_1 = arith.constant 0 : i32
    return %c0_i32, %c0_i32_0 : i32, i32
  }
  func.func @transform_2(%arg0: i32) -> (i32, i32) {
    %c0_i32 = arith.constant 0 : i32
    %c0_i32_0 = arith.constant 0 : i32
    %c0_i32_1 = arith.constant 0 : i32
    return %c0_i32, %c0_i32_0 : i32, i32
  }
  func.func @transform_3(%arg0: i32) -> (i32, i32) {
    %c0_i32 = arith.constant 0 : i32
    %c0_i32_0 = arith.constant 0 : i32
    return %arg0, %c0_i32 : i32, i32
  }
  func.func @transform_4(%arg0: i32) -> (i32, i32, i32) {
    %c0_i32 = arith.constant 0 : i32
    %c0_i32_0 = arith.constant 0 : i32
    %c0_i32_1 = arith.constant 0 : i32
    return %arg0, %c0_i32, %c0_i32_0 : i32, i32, i32
  }
}

module attributes {stable_mosaic.version = 11 : i64} {
  func.func @conv_relu_stats_kernel(%arg0: i32, %arg1: memref<16x128xbf16, #tpu.memory_space<vmem>>, %arg2: memref<128x32xbf16, #tpu.memory_space<vmem>>, %arg3: memref<1x32xf32, #tpu.memory_space<vmem>>, %arg4: memref<16x32xf32, #tpu.memory_space<vmem>>, %arg5: memref<1x2x32xf32, #tpu.memory_space<vmem>>) attributes {dimension_semantics = [#tpu.dimension_semantics<parallel>], iteration_bounds = array<i64: 1>, scalar_prefetch = 0 : i64, scratch_operands = 0 : i64, tpu.core_type = #tpu.core_type<tc>, window_params = [{transform_indices = @transform_0, window_bounds = array<i64: 16, 128>}, {pipeline_mode = #tpu.pipeline_mode<synchronous>, transform_indices = @transform_1, window_bounds = array<i64: 128, 32>}, {pipeline_mode = #tpu.pipeline_mode<synchronous>, transform_indices = @transform_2, window_bounds = array<i64: 1, 32>}, {transform_indices = @transform_3, window_bounds = array<i64: 16, 32>}, {transform_indices = @transform_4, window_bounds = array<i64: 1, 2, 32>}]} {
    %c0 = arith.constant 0 : index
    %c0_0 = arith.constant 0 : index
    %0 = vector.load %arg1[%c0, %c0_0] : memref<16x128xbf16, #tpu.memory_space<vmem>>, vector<16x128xbf16>
    %c0_1 = arith.constant 0 : index
    %c0_2 = arith.constant 0 : index
    %1 = vector.load %arg2[%c0_1, %c0_2] : memref<128x32xbf16, #tpu.memory_space<vmem>>, vector<128x32xbf16>
    %cst = arith.constant dense<0.000000e+00> : vector<16x32xf32>
    %2 = tpu.matmul %0, %1, %cst {dimension_numbers = #tpu.dot_dimension_numbers<[1], [0], [0], [1], [0, 0, 1, 1], [], []>} : vector<16x128xbf16>, vector<128x32xbf16>, vector<16x32xf32> -> vector<16x32xf32>
    %c0_3 = arith.constant 0 : index
    %c0_4 = arith.constant 0 : index
    %3 = vector.load %arg3[%c0_3, %c0_4] : memref<1x32xf32, #tpu.memory_space<vmem>>, vector<1x32xf32>
    %4 = vector.broadcast %3 : vector<1x32xf32> to vector<16x32xf32>
    %5 = arith.addf %2, %4 : vector<16x32xf32>
    %cst_5 = arith.constant 0.000000e+00 : f32
    %6 = vector.broadcast %cst_5 : f32 to vector<16x32xf32>
    %7 = arith.maximumf %5, %6 : vector<16x32xf32>
    %c0_6 = arith.constant 0 : index
    %c0_7 = arith.constant 0 : index
    %8 = vector.load %arg4[%c0_6, %c0_7] : memref<16x32xf32, #tpu.memory_space<vmem>>, vector<16x32xf32>
    tpu.vector_store %arg4[%c0_6, %c0_7], %7 {strides = array<i32>} : memref<16x32xf32, #tpu.memory_space<vmem>>, vector<16x32xf32>,
    %9 = tpu.iota {dimensions = array<i32: 0>} : vector<16x32xi32>
    %c16_i32 = arith.constant 16 : i32
    %10 = arith.muli %arg0, %c16_i32 : i32
    %11 = vector.broadcast %10 : i32 to vector<16x32xi32>
    %12 = arith.addi %9, %11 : vector<16x32xi32>
    %c6_i32 = arith.constant 6 : i32
    %13 = vector.broadcast %c6_i32 : i32 to vector<16x32xi32>
    %14 = arith.cmpi slt, %12, %13 : vector<16x32xi32>
    %cst_8 = arith.constant 0.000000e+00 : f32
    %15 = vector.broadcast %cst_8 : f32 to vector<16x32xf32>
    %16 = arith.select %14, %7, %15 : vector<16x32xi1>, vector<16x32xf32>
    %cst_9 = arith.constant dense<0.000000e+00> : vector<32xf32>
    %17 = vector.multi_reduction <add>, %16, %cst_9 [0] : vector<16x32xf32> to vector<32xf32>
    %18 = vector.shape_cast %17 : vector<32xf32> to vector<1x32xf32>
    %19 = arith.mulf %16, %16 : vector<16x32xf32>
    %cst_10 = arith.constant dense<0.000000e+00> : vector<32xf32>
    %20 = vector.multi_reduction <add>, %19, %cst_10 [0] : vector<16x32xf32> to vector<32xf32>
    %21 = vector.shape_cast %20 : vector<32xf32> to vector<1x32xf32>
    %22 = tpu.concatenate %18, %21 in 0 : vector<1x32xf32>, vector<1x32xf32> -> vector<2x32xf32>
    %c0_11 = arith.constant 0 : index
    %c0_12 = arith.constant 0 : index
    %c0_13 = arith.constant 0 : index
    %23 = vector.load %arg5[%c0_11, %c0_12, %c0_13] : memref<1x2x32xf32, #tpu.memory_space<vmem>>, vector<1x2x32xf32>
    %24 = vector.shape_cast %23 : vector<1x2x32xf32> to vector<2x32xf32>
    %25 = vector.shape_cast %22 : vector<2x32xf32> to vector<1x2x32xf32>
    tpu.vector_store %arg5[%c0_11, %c0_12, %c0_13], %25 {strides = array<i32>} : memref<1x2x32xf32, #tpu.memory_space<vmem>>, vector<1x2x32xf32>,
    return
  }
  func.func @transform_0(%arg0: i32) -> (i32, i32) {
    %c0_i32 = arith.constant 0 : i32
    %c0_i32_0 = arith.constant 0 : i32
    return %arg0, %c0_i32 : i32, i32
  }
  func.func @transform_1(%arg0: i32) -> (i32, i32) {
    %c0_i32 = arith.constant 0 : i32
    %c0_i32_0 = arith.constant 0 : i32
    %c0_i32_1 = arith.constant 0 : i32
    return %c0_i32, %c0_i32_0 : i32, i32
  }
  func.func @transform_2(%arg0: i32) -> (i32, i32) {
    %c0_i32 = arith.constant 0 : i32
    %c0_i32_0 = arith.constant 0 : i32
    %c0_i32_1 = arith.constant 0 : i32
    return %c0_i32, %c0_i32_0 : i32, i32
  }
  func.func @transform_3(%arg0: i32) -> (i32, i32) {
    %c0_i32 = arith.constant 0 : i32
    %c0_i32_0 = arith.constant 0 : i32
    return %arg0, %c0_i32 : i32, i32
  }
  func.func @transform_4(%arg0: i32) -> (i32, i32, i32) {
    %c0_i32 = arith.constant 0 : i32
    %c0_i32_0 = arith.constant 0 : i32
    %c0_i32_1 = arith.constant 0 : i32
    return %arg0, %c0_i32, %c0_i32_0 : i32, i32, i32
  }
}

module attributes {stable_mosaic.version = 11 : i64} {
  func.func @linear_kernel(%arg0: i32, %arg1: memref<16x32xbf16, #tpu.memory_space<vmem>>, %arg2: memref<32x8xbf16, #tpu.memory_space<vmem>>, %arg3: memref<1x8xf32, #tpu.memory_space<vmem>>, %arg4: memref<16x8xf32, #tpu.memory_space<vmem>>) attributes {dimension_semantics = [#tpu.dimension_semantics<parallel>], iteration_bounds = array<i64: 1>, scalar_prefetch = 0 : i64, scratch_operands = 0 : i64, tpu.core_type = #tpu.core_type<tc>, window_params = [{transform_indices = @transform_0, window_bounds = array<i64: 16, 32>}, {pipeline_mode = #tpu.pipeline_mode<synchronous>, transform_indices = @transform_1, window_bounds = array<i64: 32, 8>}, {pipeline_mode = #tpu.pipeline_mode<synchronous>, transform_indices = @transform_2, window_bounds = array<i64: 1, 8>}, {transform_indices = @transform_3, window_bounds = array<i64: 16, 8>}]} {
    %c0 = arith.constant 0 : index
    %c0_0 = arith.constant 0 : index
    %0 = vector.load %arg1[%c0, %c0_0] : memref<16x32xbf16, #tpu.memory_space<vmem>>, vector<16x32xbf16>
    %c0_1 = arith.constant 0 : index
    %c0_2 = arith.constant 0 : index
    %1 = vector.load %arg2[%c0_1, %c0_2] : memref<32x8xbf16, #tpu.memory_space<vmem>>, vector<32x8xbf16>
    %cst = arith.constant dense<0.000000e+00> : vector<16x8xf32>
    %2 = tpu.matmul %0, %1, %cst {dimension_numbers = #tpu.dot_dimension_numbers<[1], [0], [0], [1], [0, 0, 1, 1], [], []>} : vector<16x32xbf16>, vector<32x8xbf16>, vector<16x8xf32> -> vector<16x8xf32>
    %c0_3 = arith.constant 0 : index
    %c0_4 = arith.constant 0 : index
    %3 = vector.load %arg3[%c0_3, %c0_4] : memref<1x8xf32, #tpu.memory_space<vmem>>, vector<1x8xf32>
    %4 = vector.broadcast %3 : vector<1x8xf32> to vector<16x8xf32>
    %5 = arith.addf %2, %4 : vector<16x8xf32>
    %c0_5 = arith.constant 0 : index
    %c0_6 = arith.constant 0 : index
    %6 = vector.load %arg4[%c0_5, %c0_6] : memref<16x8xf32, #tpu.memory_space<vmem>>, vector<16x8xf32>
    tpu.vector_store %arg4[%c0_5, %c0_6], %5 {strides = array<i32>} : memref<16x8xf32, #tpu.memory_space<vmem>>, vector<16x8xf32>,
    return
  }
  func.func @transform_0(%arg0: i32) -> (i32, i32) {
    %c0_i32 = arith.constant 0 : i32
    %c0_i32_0 = arith.constant 0 : i32
    return %arg0, %c0_i32 : i32, i32
  }
  func.func @transform_1(%arg0: i32) -> (i32, i32) {
    %c0_i32 = arith.constant 0 : i32
    %c0_i32_0 = arith.constant 0 : i32
    %c0_i32_1 = arith.constant 0 : i32
    return %c0_i32, %c0_i32_0 : i32, i32
  }
  func.func @transform_2(%arg0: i32) -> (i32, i32) {
    %c0_i32 = arith.constant 0 : i32
    %c0_i32_0 = arith.constant 0 : i32
    %c0_i32_1 = arith.constant 0 : i32
    return %c0_i32, %c0_i32_0 : i32, i32
  }
  func.func @transform_3(%arg0: i32) -> (i32, i32) {
    %c0_i32 = arith.constant 0 : i32
    %c0_i32_0 = arith.constant 0 : i32
    return %arg0, %c0_i32 : i32, i32
  }
}

</mosaic_0001>

<bundles_post_ra>
// kernel: cnn_encoder_forward.5
= control target key start
LH: loop header
LB: loop body
LE: loop exit
PB: predicated region body
PF: predicated region fallthrough
CT: control target
= control target key end

     0   :  { %vm553_vm0 = vcmask 31744   ;;  %vm1047_vm1 = vcmask 1040384   ;;  %vm1049_vm2 = vcmask 25600   ;;  %s1878_s1 = inlined_call_operand.vmem [shape: bf16[128,4], index: 1, kind: input, shape index: {}]   ;;  %s1879_s0 = inlined_call_operand.vmem [shape: bf16[384,128], index: 0, kind: input, shape index: {}]   ;;  %s1880_s2 = inlined_call_operand.vmem [shape: f32[1,4], index: 2, kind: input, shape index: {}]   ;;  %s1881_s3 = inlined_call_operand.vmem [shape: f32[384,4], index: 3, kind: output, shape index: {0}]   ;;  %s1882_s4 = inlined_call_operand.vmem [shape: f32[1,2,4], index: 4, kind: output, shape index: {1}]  }
   0x1   :  { %v1204_v0 = vld [vmem:[%s1878_s1 + $0x38] sm:$0xff]   ;;  %v1205_v1 = vld [vmem:[%s1878_s1 + $0x30] sm:$0xff]   ;;  %v1206_v2 = vld [vmem:[%s1878_s1 + $0x28] sm:$0xff]  }
   0x2   :  { %1124 = vmatprep.subr.bf16.mxu0 %v1204_v0  ;;  %1188 = vmatprep.subr.bf16.mxu1 %v1204_v0  ;;  %v1207_v3 = vld [vmem:[%s1878_s1 + $0x20] sm:$0xff]   ;;  %v1208_v5 = vld [vmem:[%s1878_s1 + $0x18] sm:$0xff]   ;;  %v1209_v6 = vld [vmem:[%s1878_s1 + $0x10] sm:$0xff]  }
   0x3   :  { %1125 = vmatpush3.bf16.msra.mxu0 %v1204_v0  ;;  %1196 = vmatpush3.bf16.msra.mxu1 %v1204_v0  ;;  %v1212_v4 = vld [vmem:[%s1879_s0] sm:$0xff]   ;;  %v1210_v7 = vld [vmem:[%s1878_s1 + $0x8] sm:$0xff]   ;;  %v1214_v11 = vld [vmem:[%s1879_s0 + $0x10] sm:$0xff]  }
   0x4   :  { %1126 = vmatprep.subr.bf16.mxu0 %v1205_v1  ;;  %1189 = vmatprep.subr.bf16.mxu1 %v1205_v1  ;;  %v1224_v8 = vld [vmem:[%s1879_s0 + $0x60] sm:$0xff]   ;;  %v1213_v10 = vld [vmem:[%s1879_s0 + $0x8] sm:$0xff]   ;;  %v1226_v13 = vld [vmem:[%s1879_s0 + $0x70] sm:$0xff]  }
   0x5   :  { %1140 = vmatprep.mubr.bf16.mxu0 %v1212_v4  ;;  %1164 = vmatprep.mubr.bf16.mxu1 %v1224_v8  ;;  %v1211_v9 = vld [vmem:[%s1878_s1] sm:$0xff]   ;;  %v1225_v12 = vld [vmem:[%s1879_s0 + $0x68] sm:$0xff]   ;;  %v1215_v14 = vld [vmem:[%s1879_s0 + $0x18] sm:$0xff]  }
   0x6   :  { %v1227_v15 = vld [vmem:[%s1879_s0 + $0x78] sm:$0xff]   ;;  %v1216_v16 = vld [vmem:[%s1879_s0 + $0x20] sm:$0xff]   ;;  %v1217_v18 = vld [vmem:[%s1879_s0 + $0x28] sm:$0xff]  }
   0x7   :  { %1127 = vmatpush3.bf16.msra.mxu0 %v1205_v1  ;;  %1197 = vmatpush3.bf16.msra.mxu1 %v1205_v1  ;;  %v1228_v17 = vld [vmem:[%s1879_s0 + $0x80] sm:$0xff]   ;;  %v1229_v19 = vld [vmem:[%s1879_s0 + $0x88] sm:$0xff]   ;;  %v1218_v20 = vld [vmem:[%s1879_s0 + $0x30] sm:$0xff]  }
   0x8   :  { %1128 = vmatprep.subr.bf16.mxu0 %v1206_v2  ;;  %1190 = vmatprep.subr.bf16.mxu1 %v1206_v2  ;;  %v1230_v21 = vld [vmem:[%s1879_s0 + $0x90] sm:$0xff]   ;;  %v1219_v22 = vld [vmem:[%s1879_s0 + $0x38] sm:$0xff]   ;;  %v1220_v24 = vld [vmem:[%s1879_s0 + $0x40] sm:$0xff]  }
   0x9   :  { %v1231_v23 = vld [vmem:[%s1879_s0 + $0x98] sm:$0xff]   ;;  %v1232_v25 = vld [vmem:[%s1879_s0 + $0xa0] sm:$0xff]   ;;  %v1221_v26 = vld [vmem:[%s1879_s0 + $0x48] sm:$0xff]  }
   0xa   :  { %v1233_v27 = vld [vmem:[%s1879_s0 + $0xa8] sm:$0xff]   ;;  %v1222_v28 = vld [vmem:[%s1879_s0 + $0x50] sm:$0xff]   ;;  %v1223_v30 = vld [vmem:[%s1879_s0 + $0x58] sm:$0xff]  }
   0xb   :  { %1129 = vmatpush3.bf16.msra.mxu0 %v1206_v2  ;;  %1198 = vmatpush3.bf16.msra.mxu1 %v1206_v2  ;;  %v1234_v29 = vld [vmem:[%s1879_s0 + $0xb0] sm:$0xff]   ;;  %v1235_v31 = vld [vmem:[%s1879_s0 + $0xb8] sm:$0xff]   ;;  %v1360_v32 = vld [vmem:[%s1880_s2] ss:$0 sm:$0xff] }
   0xc   :  { %1130 = vmatprep.subr.bf16.mxu0 %v1207_v3  ;;  %1191 = vmatprep.subr.bf16.mxu1 %v1207_v3 }
   0xf   :  { %1131 = vmatpush3.bf16.msra.mxu0 %v1207_v3  ;;  %1199 = vmatpush3.bf16.msra.mxu1 %v1207_v3 }
  0x10   :  { %1132 = vmatprep.subr.bf16.mxu0 %v1208_v5  ;;  %1192 = vmatprep.subr.bf16.mxu1 %v1208_v5 }
  0x13   :  { %1133 = vmatpush3.bf16.msra.mxu0 %v1208_v5  ;;  %1200 = vmatpush3.bf16.msra.mxu1 %v1208_v5 }
  0x14   :  { %1134 = vmatprep.subr.bf16.mxu0 %v1209_v6  ;;  %1193 = vmatprep.subr.bf16.mxu1 %v1209_v6 }
  0x17   :  { %1135 = vmatpush3.bf16.msra.mxu0 %v1209_v6  ;;  %1201 = vmatpush3.bf16.msra.mxu1 %v1209_v6 }
  0x18   :  { %1136 = vmatprep.subr.bf16.mxu0 %v1210_v7  ;;  %1194 = vmatprep.subr.bf16.mxu1 %v1210_v7 }
  0x1b   :  { %1137 = vmatpush3.bf16.msra.mxu0 %v1210_v7  ;;  %1202 = vmatpush3.bf16.msra.mxu1 %v1210_v7 }
  0x1c   :  { %1138 = vmatprep.subr.bf16.mxu0 %v1211_v9  ;;  %1195 = vmatprep.subr.bf16.mxu1 %v1211_v9 }
  0x1f   :  { %1139 = vmatpush3.bf16.msra.mxu0 %v1211_v9  ;;  %1203 = vmatpush3.bf16.msra.mxu1 %v1211_v9 }
  0x22   :  { %1141 = vmatmul.mubr.bf16.vlgmr.msra.gmra.mxu0 %v1213_v10  ;;  %1165 = vmatmul.mubr.bf16.vlgmr.msra.gmra.mxu1 %v1225_v12 }
  0x23   :  { %1144 = vmatprep.mubr.bf16.mxu0 %v1214_v11  ;;  %1168 = vmatprep.mubr.bf16.mxu1 %v1226_v13 }
  0x2a   :  { %1145 = vmatmul.mubr.bf16.gmra.mxu0 %v1215_v14  ;;  %1169 = vmatmul.mubr.bf16.gmra.mxu1 %v1227_v15 }
  0x2b   :  { %1148 = vmatprep.mubr.bf16.mxu0 %v1216_v16  ;;  %1172 = vmatprep.mubr.bf16.mxu1 %v1228_v17 }
  0x32   :  { %1149 = vmatmul.mubr.bf16.gmra.mxu0 %v1217_v18  ;;  %1173 = vmatmul.mubr.bf16.gmra.mxu1 %v1229_v19 }
  0x33   :  { %1152 = vmatprep.mubr.bf16.mxu0 %v1218_v20  ;;  %1176 = vmatprep.mubr.bf16.mxu1 %v1230_v21 }
  0x3a   :  { %1153 = vmatmul.mubr.bf16.gmra.mxu0 %v1219_v22  ;;  %1177 = vmatmul.mubr.bf16.gmra.mxu1 %v1231_v23 }
  0x3b   :  { %1156 = vmatprep.mubr.bf16.mxu0 %v1220_v24  ;;  %1180 = vmatprep.mubr.bf16.mxu1 %v1232_v25 }
  0x42   :  { %1157 = vmatmul.mubr.bf16.gmra.mxu0 %v1221_v26  ;;  %1181 = vmatmul.mubr.bf16.gmra.mxu1 %v1233_v27 }
  0x43   :  { %1160 = vmatprep.mubr.bf16.mxu0 %v1222_v28  ;;  %1184 = vmatprep.mubr.bf16.mxu1 %v1234_v29 }
  0x4a   :  { %1161 = vmatmul.mubr.bf16.gmra.mxu0 %v1223_v30  ;;  %1185 = vmatmul.mubr.bf16.gmra.mxu1 %v1235_v31 }
  0xe2   :  { %v1142_v33 = vpop.f32.mrf.mxu0  ;;  %v1166_v34 = vpop.f32.mrf.mxu1 }
  0xe3   :  { %v323_v35 = vadd.f32 %v1142_v33, %v1360_v32  ;;  %v419_v36 = vadd.f32 %v1166_v34, %v1360_v32 }
  0xe4   :  { %v314_v37 = vpop.f32.mrf.mxu0  ;;  %v410_v38 = vpop.f32.mrf.mxu1 }
  0xe5   :  { %v507_v39 = vmax.f32 %v323_v35, 0.0  ;;  %v315_v40 = vadd.f32 %v1360_v32, %v314_v37  ;;  %v1365_v41 = vmax.f32 %v419_v36, 0.0  ;;  %v411_v42 = vadd.f32 %v1360_v32, %v410_v38 }
  0xe6   :  { %v1143_v43 = vpop.f32.mrf.mxu0  ;;  %v1167_v44 = vpop.f32.mrf.mxu1 }
  0xe7   :  { %556 = vst.msk [vmem:[%s1881_s3 + $0x10] sm:$0xff] %vm553_vm0, %v507_v39  ;;  %v505_v45 = vmax.f32 %v315_v40, 0.0  ;;  %v326_v46 = vadd.f32 %v1143_v43, %v1360_v32  ;;  %580 = vst.msk [vmem:[%s1881_s3 + $0xd0] sm:$0xff] %vm553_vm0, %v1365_v41  ;;  %v1378_v48 = vmax.f32 %v411_v42, 0.0  ;;  %v422_v49 = vadd.f32 %v1167_v44, %v1360_v32 }
  0xe8   :  { %v317_v47 = vpop.f32.mrf.mxu0  ;;  %v413_v50 = vpop.f32.mrf.mxu1  ;;  %v900_v62 = vmul.f32 %v507_v39, %v507_v39  ;;  %v800_v6 = vsel %vm553_vm0, %v507_v39, 0.0 }
  0xe9   :  { %554 = vst.msk [vmem:[%s1881_s3] sm:$0xff] %vm553_vm0, %v505_v45  ;;  %v508_v51 = vmax.f32 %v326_v46, 0.0  ;;  %v318_v52 = vadd.f32 %v1360_v32, %v317_v47  ;;  %578 = vst.msk [vmem:[%s1881_s3 + $0xc0] sm:$0xff] %vm553_vm0, %v1378_v48  ;;  %v898_v55 = vmul.f32 %v505_v45, %v505_v45  ;;  %v1396_v59 = vmax.f32 %v422_v49, 0.0 }
  0xea   :  { %v1146_v53 = vpop.f32.mrf.mxu0  ;;  %v1170_v54 = vpop.f32.mrf.mxu1  ;;  %v414_v60 = vadd.f32 %v1360_v32, %v413_v50  ;;  %v797_v1 = vsel %vm553_vm0, %v505_v45, 0.0  ;;  %v949_v16 = vsel %vm553_vm0, %v900_v62, 0.0 }
  0xeb   :  { %557 = vst.msk [vmem:[%s1881_s3 + $0x18] sm:$0xff] %vm553_vm0, %v508_v51  ;;  %v339_v56 = vadd.f32 %v1146_v53, %v1360_v32  ;;  %v506_v57 = vmax.f32 %v318_v52, 0.0  ;;  %581 = vst.msk [vmem:[%s1881_s3 + $0xd8] sm:$0xff] %vm553_vm0, %v1396_v59  ;;  %v946_v7 = vsel %vm553_vm0, %v898_v55, 0.0  ;;  %v901_v10 = vmul.f32 %v508_v51, %v508_v51 }
  0xec   :  { %v330_v58 = vpop.f32.mrf.mxu0  ;;  %v1399_v61 = vpop.f32.mrf.mxu1  ;;  %v1423_v14 = vmax.f32 %v414_v60, 0.0  ;;  %v802_v19 = vsel %vm553_vm0, %v508_v51, 0.0  ;;  %v435_v33 = vadd.f32 %v1170_v54, %v1360_v32 }
  0xed   :  { %v511_v63 = vmax.f32 %v339_v56, 0.0  ;;  %v331_v0 = vadd.f32 %v1360_v32, %v330_v58  ;;  %555 = vst.msk [vmem:[%s1881_s3 + $0x8] sm:$0xff] %vm553_vm0, %v506_v57  ;;  %v798_v2 = vsel %vm553_vm0, %v506_v57, 0.0  ;;  %v899_v3 = vmul.f32 %v506_v57, %v506_v57 }
  0xee   :  { %v1147_v4 = vpop.f32.mrf.mxu0  ;;  %v1413_v5 = vpop.f32.mrf.mxu1  ;;  %v799_v8 = vadd.f32 %v798_v2, %v797_v1  ;;  %579 = vst.msk [vmem:[%s1881_s3 + $0xc8] sm:$0xff] %vm553_vm0, %v1423_v14  ;;  %v951_v28 = vsel %vm553_vm0, %v901_v10, 0.0  ;;  %v1467_v55 = vmax.f32 %v435_v33, 0.0  ;;  %v427_v33 = vadd.f32 %v1360_v32, %v1399_v61 }
  0xef   :  { %560 = vst.msk [vmem:[%s1881_s3 + $0x30] sm:$0xff] %vm553_vm0, %v511_v63  ;;  %v509_v9 = vmax.f32 %v331_v0, 0.0  ;;  %v947_v11 = vsel %vm553_vm0, %v899_v3, 0.0  ;;  %v342_v12 = vadd.f32 %v1147_v4, %v1360_v32  ;;  %v904_v39 = vmul.f32 %v511_v63, %v511_v63 }
  0xf0   :  { %v333_v13 = vpop.f32.mrf.mxu0  ;;  %v1425_v15 = vpop.f32.mrf.mxu1  ;;  %v801_v17 = vadd.f32 %v800_v6, %v799_v8  ;;  %v948_v18 = vadd.f32 %v947_v11, %v946_v7  ;;  %v808_v46 = vsel %vm553_vm0, %v511_v63, 0.0  ;;  %584 = vst.msk [vmem:[%s1881_s3 + $0xf0] sm:$0xff] %vm553_vm0, %v1467_v55 }
  0xf1   :  { %558 = vst.msk [vmem:[%s1881_s3 + $0x20] sm:$0xff] %vm553_vm0, %v509_v9  ;;  %v902_v20 = vmul.f32 %v509_v9, %v509_v9  ;;  %v512_v21 = vmax.f32 %v342_v12, 0.0  ;;  %v334_v22 = vadd.f32 %v1360_v32, %v333_v13  ;;  %v804_v29 = vsel %vm553_vm0, %v509_v9, 0.0 }
  0xf2   :  { %v1150_v23 = vpop.f32.mrf.mxu0  ;;  %v1439_v24 = vpop.f32.mrf.mxu1  ;;  %v950_v25 = vadd.f32 %v949_v16, %v948_v18  ;;  %v803_v26 = vadd.f32 %v802_v19, %v801_v17  ;;  %v957_v60 = vsel %vm553_vm0, %v904_v39, 0.0 }
  0xf3   :  { %v355_v27 = vadd.f32 %v1150_v23, %v1360_v32  ;;  %561 = vst.msk [vmem:[%s1881_s3 + $0x38] sm:$0xff] %vm553_vm0, %v512_v21  ;;  %v510_v30 = vmax.f32 %v334_v22, 0.0  ;;  %v953_v40 = vsel %vm553_vm0, %v902_v20, 0.0  ;;  %v905_v49 = vmul.f32 %v512_v21, %v512_v21 }
  0xf4   :  { %v346_v31 = vpop.f32.mrf.mxu0  ;;  %v1449_v34 = vpop.f32.mrf.mxu1  ;;  %v805_v35 = vadd.f32 %v804_v29, %v803_v26  ;;  %v952_v36 = vadd.f32 %v951_v28, %v950_v25  ;;  %v810_v62 = vsel %vm553_vm0, %v512_v21, 0.0 }
  0xf5   :  { %v515_v37 = vmax.f32 %v355_v27, 0.0  ;;  %v347_v38 = vadd.f32 %v1360_v32, %v346_v31  ;;  %559 = vst.msk [vmem:[%s1881_s3 + $0x28] sm:$0xff] %vm553_vm0, %v510_v30  ;;  %v806_v42 = vsel %vm553_vm0, %v510_v30, 0.0  ;;  %v903_v43 = vmul.f32 %v510_v30, %v510_v30 }
  0xf6   :  { %v1151_v44 = vpop.f32.mrf.mxu0  ;;  %v1458_v45 = vpop.f32.mrf.mxu1  ;;  %v954_v47 = vadd.f32 %v953_v40, %v952_v36  ;;  %v807_v50 = vadd.f32 %v806_v42, %v805_v35  ;;  %v959_v8 = vsel %vm553_vm0, %v905_v49, 0.0 }
  0xf7   :  { %564 = vst.msk [vmem:[%s1881_s3 + $0x50] sm:$0xff] %vm553_vm0, %v515_v37  ;;  %v955_v51 = vsel %vm553_vm0, %v903_v43, 0.0  ;;  %v513_v52 = vmax.f32 %v347_v38, 0.0  ;;  %v358_v53 = vadd.f32 %v1151_v44, %v1360_v32  ;;  %v908_v17 = vmul.f32 %v515_v37, %v515_v37 }
  0xf8   :  { %v349_v54 = vpop.f32.mrf.mxu0  ;;  %v809_v56 = vadd.f32 %v808_v46, %v807_v50  ;;  %v956_v57 = vadd.f32 %v955_v51, %v954_v47  ;;  %v1481_v2 = vpop.f32.mrf.mxu1  ;;  %v816_v28 = vsel %vm553_vm0, %v515_v37, 0.0  ;;  %v1515_v44 = vmax.f32 %v427_v33, 0.0 }
  0xf9   :  { %v350_v58 = vadd.f32 %v1360_v32, %v349_v54  ;;  %562 = vst.msk [vmem:[%s1881_s3 + $0x40] sm:$0xff] %vm553_vm0, %v513_v52  ;;  %v906_v63 = vmul.f32 %v513_v52, %v513_v52  ;;  %v516_v0 = vmax.f32 %v358_v53, 0.0  ;;  %v812_v9 = vsel %vm553_vm0, %v513_v52, 0.0 }
  0xfa   :  { %v1154_v1 = vpop.f32.mrf.mxu0  ;;  %v958_v3 = vadd.f32 %v957_v60, %v956_v57  ;;  %v811_v4 = vadd.f32 %v810_v62, %v809_v56  ;;  %v1497_v22 = vpop.f32.mrf.mxu1  ;;  %v965_v40 = vsel %vm553_vm0, %v908_v17, 0.0  ;;  %582 = vst.msk [vmem:[%s1881_s3 + $0xe0] sm:$0xff] %vm553_vm0, %v1515_v44 }
  0xfb   :  { %v514_v6 = vmax.f32 %v350_v58, 0.0  ;;  %v371_v7 = vadd.f32 %v1154_v1, %v1360_v32  ;;  %565 = vst.msk [vmem:[%s1881_s3 + $0x58] sm:$0xff] %vm553_vm0, %v516_v0  ;;  %v961_v18 = vsel %vm553_vm0, %v906_v63, 0.0  ;;  %v909_v29 = vmul.f32 %v516_v0, %v516_v0 }
  0xfc   :  { %v362_v10 = vpop.f32.mrf.mxu0  ;;  %v813_v11 = vadd.f32 %v812_v9, %v811_v4  ;;  %v960_v12 = vadd.f32 %v959_v8, %v958_v3  ;;  %v818_v37 = vsel %vm553_vm0, %v516_v0, 0.0  ;;  %v1517_v46 = vpop.f32.mrf.mxu1 }
  0xfd   :  { %563 = vst.msk [vmem:[%s1881_s3 + $0x48] sm:$0xff] %vm553_vm0, %v514_v6  ;;  %v814_v13 = vsel %vm553_vm0, %v514_v6, 0.0  ;;  %v907_v16 = vmul.f32 %v514_v6, %v514_v6  ;;  %v519_v19 = vmax.f32 %v371_v7, 0.0  ;;  %v363_v20 = vadd.f32 %v1360_v32, %v362_v10 }
  0xfe   :  { %v1155_v21 = vpop.f32.mrf.mxu0  ;;  %v962_v23 = vadd.f32 %v961_v18, %v960_v12  ;;  %v815_v25 = vadd.f32 %v814_v13, %v813_v11  ;;  %v967_v49 = vsel %vm553_vm0, %v909_v29, 0.0  ;;  %v1538_v3 = vpop.f32.mrf.mxu1 }
  0xff   :  { %v963_v26 = vsel %vm553_vm0, %v907_v16, 0.0  ;;  %v374_v27 = vadd.f32 %v1155_v21, %v1360_v32  ;;  %568 = vst.msk [vmem:[%s1881_s3 + $0x70] sm:$0xff] %vm553_vm0, %v519_v19  ;;  %v517_v30 = vmax.f32 %v363_v20, 0.0  ;;  %v912_v54 = vmul.f32 %v519_v19, %v519_v19 }
 0x100   :  { %v365_v31 = vpop.f32.mrf.mxu0  ;;  %v817_v35 = vadd.f32 %v816_v28, %v815_v25  ;;  %v964_v36 = vadd.f32 %v963_v26, %v962_v23  ;;  %v824_v9 = vsel %vm553_vm0, %v519_v19, 0.0  ;;  %v438_v25 = vadd.f32 %v1413_v5, %v1360_v32  ;;  %v1556_v26 = vpop.f32.mrf.mxu1 }
 0x101   :  { %v520_v38 = vmax.f32 %v374_v27, 0.0  ;;  %v366_v39 = vadd.f32 %v1360_v32, %v365_v31  ;;  %566 = vst.msk [vmem:[%s1881_s3 + $0x60] sm:$0xff] %vm553_vm0, %v517_v30  ;;  %v910_v42 = vmul.f32 %v517_v30, %v517_v30  ;;  %v820_v50 = vsel %vm553_vm0, %v517_v30, 0.0 }
 0x102   :  { %v1158_v43 = vpop.f32.mrf.mxu0  ;;  %v966_v61 = vadd.f32 %v965_v40, %v964_v36  ;;  %v819_v47 = vadd.f32 %v818_v37, %v817_v35  ;;  %v973_v13 = vsel %vm553_vm0, %v912_v54, 0.0  ;;  %v1565_v36 = vmax.f32 %v438_v25, 0.0 }
 0x103   :  { %569 = vst.msk [vmem:[%s1881_s3 + $0x78] sm:$0xff] %vm553_vm0, %v520_v38  ;;  %v518_v51 = vmax.f32 %v366_v39, 0.0  ;;  %v387_v52 = vadd.f32 %v1158_v43, %v1360_v32  ;;  %v969_v60 = vsel %vm553_vm0, %v910_v42, 0.0  ;;  %v913_v10 = vmul.f32 %v520_v38, %v520_v38 }
 0x104   :  { %v378_v53 = vpop.f32.mrf.mxu0  ;;  %v821_v56 = vadd.f32 %v820_v50, %v819_v47  ;;  %v968_v57 = vadd.f32 %v967_v49, %v966_v61  ;;  %v826_v16 = vsel %vm553_vm0, %v520_v38, 0.0  ;;  %585 = vst.msk [vmem:[%s1881_s3 + $0xf8] sm:$0xff] %vm553_vm0, %v1565_v36  ;;  %v1579_v49 = vpop.f32.mrf.mxu1 }
 0x105   :  { %v379_v58 = vadd.f32 %v1360_v32, %v378_v53  ;;  %567 = vst.msk [vmem:[%s1881_s3 + $0x68] sm:$0xff] %vm553_vm0, %v518_v51  ;;  %v822_v62 = vsel %vm553_vm0, %v518_v51, 0.0  ;;  %v911_v63 = vmul.f32 %v518_v51, %v518_v51  ;;  %v523_v0 = vmax.f32 %v387_v52, 0.0 }
 0x106   :  { %v1159_v1 = vpop.f32.mrf.mxu0  ;;  %v970_v4 = vadd.f32 %v969_v60, %v968_v57  ;;  %v823_v6 = vadd.f32 %v822_v62, %v821_v56  ;;  %v975_v30 = vsel %vm553_vm0, %v913_v10, 0.0 }
 0x107   :  { %v521_v7 = vmax.f32 %v379_v58, 0.0  ;;  %v390_v8 = vadd.f32 %v1159_v1, %v1360_v32  ;;  %v971_v11 = vsel %vm553_vm0, %v911_v63, 0.0  ;;  %572 = vst.msk [vmem:[%s1881_s3 + $0x90] sm:$0xff] %vm553_vm0, %v523_v0  ;;  %v916_v37 = vmul.f32 %v523_v0, %v523_v0 }
 0x108   :  { %v381_v12 = vpop.f32.mrf.mxu0  ;;  %v825_v17 = vadd.f32 %v824_v9, %v823_v6  ;;  %v972_v18 = vadd.f32 %v971_v11, %v970_v4  ;;  %v832_v50 = vsel %vm553_vm0, %v523_v0, 0.0  ;;  %v430_v11 = vadd.f32 %v1360_v32, %v1425_v15 }
 0x109   :  { %570 = vst.msk [vmem:[%s1881_s3 + $0x80] sm:$0xff] %vm553_vm0, %v521_v7  ;;  %v914_v19 = vmul.f32 %v521_v7, %v521_v7  ;;  %v524_v20 = vmax.f32 %v390_v8, 0.0  ;;  %v382_v21 = vadd.f32 %v1360_v32, %v381_v12  ;;  %v828_v31 = vsel %vm553_vm0, %v521_v7, 0.0  ;;  %v1595_v7 = vpop.f32.mrf.mxu1 }
 0x10a   :  { %v1162_v23 = vpop.f32.mrf.mxu0  ;;  %v974_v27 = vadd.f32 %v973_v13, %v972_v18  ;;  %v827_v28 = vadd.f32 %v826_v16, %v825_v17  ;;  %v981_v0 = vsel %vm553_vm0, %v916_v37, 0.0  ;;  %v451_v17 = vadd.f32 %v1439_v24, %v1360_v32 }
 0x10b   :  { %v403_v29 = vadd.f32 %v1162_v23, %v1360_v32  ;;  %573 = vst.msk [vmem:[%s1881_s3 + $0x98] sm:$0xff] %vm553_vm0, %v524_v20  ;;  %v522_v33 = vmax.f32 %v382_v21, 0.0  ;;  %v977_v42 = vsel %vm553_vm0, %v914_v19, 0.0  ;;  %v917_v53 = vmul.f32 %v524_v20, %v524_v20  ;;  %v1183_v24 = vpop.f32.mrf.mxu1 }
 0x10c   :  { %v394_v35 = vpop.f32.mrf.mxu0  ;;  %v829_v5 = vadd.f32 %v828_v31, %v827_v28  ;;  %v976_v38 = vadd.f32 %v975_v30, %v974_v27  ;;  %v834_v1 = vsel %vm553_vm0, %v524_v20, 0.0  ;;  %v1613_v23 = vmax.f32 %v430_v11, 0.0 }
 0x10d   :  { %v527_v39 = vmax.f32 %v403_v29, 0.0  ;;  %v395_v40 = vadd.f32 %v1360_v32, %v394_v35  ;;  %571 = vst.msk [vmem:[%s1881_s3 + $0x88] sm:$0xff] %vm553_vm0, %v522_v33  ;;  %v830_v43 = vsel %vm553_vm0, %v522_v33, 0.0  ;;  %v915_v61 = vmul.f32 %v522_v33, %v522_v33 }
 0x10e   :  { %v1163_v47 = vpop.f32.mrf.mxu0  ;;  %v978_v51 = vadd.f32 %v977_v42, %v976_v38  ;;  %v831_v52 = vadd.f32 %v830_v43, %v829_v5  ;;  %v983_v12 = vsel %vm553_vm0, %v917_v53, 0.0  ;;  %v1615_v25 = vmax.f32 %v451_v17, 0.0  ;;  %583 = vst.msk [vmem:[%s1881_s3 + $0xe8] sm:$0xff] %vm553_vm0, %v1613_v23 }
 0x10f   :  { %576 = vst.msk [vmem:[%s1881_s3 + $0xb0] sm:$0xff] %vm553_vm0, %v527_v39  ;;  %v979_v54 = vsel %vm553_vm0, %v915_v61, 0.0  ;;  %v525_v56 = vmax.f32 %v395_v40, 0.0  ;;  %v406_v57 = vadd.f32 %v1163_v47, %v1360_v32  ;;  %v920_v13 = vmul.f32 %v527_v39, %v527_v39  ;;  %v477_v61 = vpop.f32.mrf.mxu1 }
 0x110   :  { %v397_v58 = vpop.f32.mrf.mxu0  ;;  %v833_v60 = vadd.f32 %v832_v50, %v831_v52  ;;  %v980_v62 = vadd.f32 %v979_v54, %v978_v51  ;;  %v443_v27 = vadd.f32 %v1360_v32, %v1449_v34  ;;  %v454_v31 = vadd.f32 %v1458_v45, %v1360_v32  ;;  %588 = vst.msk [vmem:[%s1881_s3 + $0x110] sm:$0xff] %vm553_vm0, %v1615_v25 }
 0x111   :  { %v398_v63 = vadd.f32 %v1360_v32, %v397_v58  ;;  %574 = vst.msk [vmem:[%s1881_s3 + $0xa0] sm:$0xff] %vm553_vm0, %v525_v56  ;;  %v918_v4 = vmul.f32 %v525_v56, %v525_v56  ;;  %v528_v6 = vmax.f32 %v406_v57, 0.0  ;;  %v836_v16 = vsel %vm553_vm0, %v525_v56, 0.0 }
 0x112   :  { %v982_v8 = vadd.f32 %v981_v0, %v980_v62  ;;  %v835_v9 = vadd.f32 %v834_v1, %v833_v60  ;;  %v840_v33 = vsel %vm553_vm0, %v527_v39, 0.0  ;;  %v922_v5 = vmul.f32 %v1378_v48, %v1378_v48 }
 0x113   :  { %v526_v10 = vmax.f32 %v398_v63, 0.0  ;;  %577 = vst.msk [vmem:[%s1881_s3 + $0xb8] sm:$0xff] %vm553_vm0, %v528_v6  ;;  %v985_v21 = vsel %vm553_vm0, %v918_v4, 0.0  ;;  %v921_v35 = vmul.f32 %v528_v6, %v528_v6  ;;  %v1635_v38 = vmax.f32 %v443_v27, 0.0 }
 0x114   :  { %v837_v18 = vadd.f32 %v836_v16, %v835_v9  ;;  %v984_v19 = vadd.f32 %v983_v12, %v982_v8  ;;  %v1637_v39 = vmax.f32 %v454_v31, 0.0  ;;  %v989_v40 = vsel %vm553_vm0, %v920_v13, 0.0 }
 0x115   :  { %575 = vst.msk [vmem:[%s1881_s3 + $0xa8] sm:$0xff] %vm553_vm0, %v526_v10  ;;  %v838_v15 = vsel %vm553_vm0, %v526_v10, 0.0  ;;  %v919_v20 = vmul.f32 %v526_v10, %v526_v10  ;;  %v842_v37 = vsel %vm553_vm0, %v528_v6, 0.0  ;;  %v446_v42 = vadd.f32 %v1360_v32, %v1481_v2  ;;  %586 = vst.msk [vmem:[%s1881_s3 + $0x100] sm:$0xff] %vm553_vm0, %v1635_v38 }
 0x116   :  { %v986_v28 = vadd.f32 %v985_v21, %v984_v19  ;;  %v839_v29 = vadd.f32 %v838_v15, %v837_v18  ;;  %v467_v43 = vadd.f32 %v1497_v22, %v1360_v32  ;;  %v844_v47 = vsel %vm553_vm0, %v1378_v48, 0.0  ;;  %589 = vst.msk [vmem:[%s1881_s3 + $0x118] sm:$0xff] %vm553_vm0, %v1637_v39 }
 0x117   :  { %v987_v30 = vsel %vm553_vm0, %v919_v20, 0.0  ;;  %v991_v2 = vsel %vm553_vm0, %v921_v35, 0.0  ;;  %v923_v22 = vmul.f32 %v1423_v14, %v1423_v14  ;;  %v1660_v48 = vmax.f32 %v446_v42, 0.0 }
 0x118   :  { %v841_v34 = vadd.f32 %v840_v33, %v839_v29  ;;  %v988_v45 = vadd.f32 %v987_v30, %v986_v28  ;;  %v1662_v52 = vmax.f32 %v467_v43, 0.0  ;;  %v924_v53 = vmul.f32 %v1365_v41, %v1365_v41 }
 0x119   :  { %v459_v57 = vadd.f32 %v1360_v32, %v1517_v46  ;;  %v848_v58 = vsel %vm553_vm0, %v1365_v41, 0.0  ;;  %v993_v60 = vsel %vm553_vm0, %v922_v5, 0.0  ;;  %v846_v62 = vsel %vm553_vm0, %v1423_v14, 0.0  ;;  %587 = vst.msk [vmem:[%s1881_s3 + $0x108] sm:$0xff] %vm553_vm0, %v1660_v48  ;;  %v1186_v46 = vpop.f32.mrf.mxu1 }
 0x11a   :  { %v990_v50 = vadd.f32 %v989_v40, %v988_v45  ;;  %v843_v51 = vadd.f32 %v842_v37, %v841_v34  ;;  %592 = vst.msk [vmem:[%s1881_s3 + $0x130] sm:$0xff] %vm553_vm0, %v1662_v52  ;;  %v925_v41 = vmul.f32 %v1396_v59, %v1396_v59  ;;  %v995_v14 = vsel %vm553_vm0, %v923_v22, 0.0 }
 0x11b   :  { %v1685_v1 = vmax.f32 %v459_v57, 0.0  ;;  %v470_v4 = vadd.f32 %v1538_v3, %v1360_v32  ;;  %v462_v6 = vadd.f32 %v1360_v32, %v1556_v26  ;;  %v483_v8 = vadd.f32 %v1579_v49, %v1360_v32  ;;  %v490_v16 = vpop.f32.mrf.mxu1 }
 0x11c   :  { %v845_v54 = vadd.f32 %v844_v47, %v843_v51  ;;  %v992_v56 = vadd.f32 %v991_v2, %v990_v50  ;;  %v997_v9 = vsel %vm553_vm0, %v924_v53, 0.0  ;;  %v850_v10 = vsel %vm553_vm0, %v1396_v59, 0.0 }
 0x11d   :  { %590 = vst.msk [vmem:[%s1881_s3 + $0x120] sm:$0xff] %vm553_vm0, %v1685_v1  ;;  %v926_v3 = vmul.f32 %v1515_v44, %v1515_v44  ;;  %v1704_v26 = vmax.f32 %v470_v4, 0.0  ;;  %v1706_v13 = vmax.f32 %v462_v6, 0.0  ;;  %v1708_v49 = vmax.f32 %v483_v8, 0.0  ;;  %v1187_v31 = vpop.f32.mrf.mxu1 }
 0x11e   :  { %v847_v63 = vadd.f32 %v846_v62, %v845_v54  ;;  %v994_v0 = vadd.f32 %v993_v60, %v992_v56  ;;  %v475_v18 = vadd.f32 %v1360_v32, %v1595_v7  ;;  %v486_v19 = vadd.f32 %v1183_v24, %v1360_v32 }
 0x11f   :  { %v999_v15 = vsel %vm553_vm0, %v925_v41, 0.0  ;;  %v928_v20 = vmul.f32 %v1467_v55, %v1467_v55  ;;  %v852_v21 = vsel %vm553_vm0, %v1515_v44, 0.0  ;;  %v927_v27 = vmul.f32 %v1613_v23, %v1613_v23  ;;  %593 = vst.msk [vmem:[%s1881_s3 + $0x138] sm:$0xff] %vm553_vm0, %v1704_v26  ;;  %591 = vst.msk [vmem:[%s1881_s3 + $0x128] sm:$0xff] %vm553_vm0, %v1706_v13  ;;  %v493_v2 = vpop.f32.mrf.mxu1 }
 0x120   :  { %v849_v11 = vadd.f32 %v848_v58, %v847_v63  ;;  %v996_v12 = vadd.f32 %v995_v14, %v994_v0  ;;  %596 = vst.msk [vmem:[%s1881_s3 + $0x150] sm:$0xff] %vm553_vm0, %v1708_v49  ;;  %v1001_v24 = vsel %vm553_vm0, %v926_v3, 0.0  ;;  %v854_v28 = vsel %vm553_vm0, %v1613_v23, 0.0 }
 0x121   :  { %v1738_v29 = vmax.f32 %v475_v18, 0.0  ;;  %v1740_v30 = vmax.f32 %v486_v19, 0.0  ;;  %v929_v35 = vmul.f32 %v1565_v36, %v1565_v36  ;;  %v478_v34 = vadd.f32 %v1360_v32, %v477_v61 }
 0x122   :  { %v998_v17 = vadd.f32 %v997_v9, %v996_v12  ;;  %v851_v59 = vadd.f32 %v850_v10, %v849_v11  ;;  %v856_v45 = vsel %vm553_vm0, %v1467_v55, 0.0  ;;  %v1005_v40 = vsel %vm553_vm0, %v928_v20, 0.0 }
 0x123   :  { %v1003_v37 = vsel %vm553_vm0, %v927_v27, 0.0  ;;  %594 = vst.msk [vmem:[%s1881_s3 + $0x140] sm:$0xff] %vm553_vm0, %v1738_v29  ;;  %597 = vst.msk [vmem:[%s1881_s3 + $0x158] sm:$0xff] %vm553_vm0, %v1740_v30  ;;  %v858_v23 = vsel %vm553_vm0, %v1565_v36, 0.0  ;;  %v1761_v43 = vmax.f32 %v478_v34, 0.0  ;;  %v930_v61 = vmul.f32 %v1635_v38, %v1635_v38 }
 0x124   :  { %v853_v44 = vadd.f32 %v852_v21, %v851_v59  ;;  %v1000_v7 = vadd.f32 %v999_v15, %v998_v17  ;;  %v499_v47 = vadd.f32 %v1186_v46, %v1360_v32  ;;  %v491_v50 = vadd.f32 %v1360_v32, %v490_v16 }
 0x125   :  { %v502_v51 = vadd.f32 %v1187_v31, %v1360_v32  ;;  %v1007_v22 = vsel %vm553_vm0, %v929_v35, 0.0  ;;  %v860_v36 = vsel %vm553_vm0, %v1635_v38, 0.0  ;;  %595 = vst.msk [vmem:[%s1881_s3 + $0x148] sm:$0xff] %vm553_vm0, %v1761_v43  ;;  %v931_v56 = vmul.f32 %v1660_v48, %v1660_v48 }
 0x126   :  { %v1002_v33 = vadd.f32 %v1001_v24, %v1000_v7  ;;  %v855_v5 = vadd.f32 %v854_v28, %v853_v44  ;;  %v1778_v57 = vmax.f32 %v499_v47, 0.0  ;;  %v1780_v58 = vmax.f32 %v491_v50, 0.0 }
 0x127   :  { %v1782_v60 = vmax.f32 %v502_v51, 0.0  ;;  %v494_v41 = vadd.f32 %v1360_v32, %v493_v2  ;;  %v932_v38 = vmul.f32 %v1615_v25, %v1615_v25  ;;  %v1009_v63 = vsel %vm553_vm0, %v930_v61, 0.0 }
 0x128   :  { %v857_v55 = vadd.f32 %v856_v45, %v855_v5  ;;  %v1004_v42 = vadd.f32 %v1003_v37, %v1002_v33  ;;  %v862_v0 = vsel %vm553_vm0, %v1660_v48, 0.0  ;;  %600 = vst.msk [vmem:[%s1881_s3 + $0x170] sm:$0xff] %vm553_vm0, %v1778_v57  ;;  %598 = vst.msk [vmem:[%s1881_s3 + $0x160] sm:$0xff] %vm553_vm0, %v1780_v58  ;;  %v864_v14 = vsel %vm553_vm0, %v1615_v25, 0.0 }
 0x129   :  { %601 = vst.msk [vmem:[%s1881_s3 + $0x178] sm:$0xff] %vm553_vm0, %v1782_v60  ;;  %v933_v4 = vmul.f32 %v1637_v39, %v1637_v39  ;;  %v1011_v6 = vsel %vm553_vm0, %v931_v56, 0.0  ;;  %v550_v8 = vmax.f32 %v494_v41, 0.0  ;;  %v1013_v11 = vsel %vm553_vm0, %v932_v38, 0.0 }
 0x12a   :  { %v1006_v53 = vadd.f32 %v1005_v40, %v1004_v42  ;;  %v859_v54 = vadd.f32 %v858_v23, %v857_v55  ;;  %v866_v12 = vsel %vm553_vm0, %v1637_v39, 0.0  ;;  %v934_v3 = vmul.f32 %v1685_v1, %v1685_v1 }
 0x12b   :  { %599 = vst.msk [vmem:[%s1881_s3 + $0x168] sm:$0xff] %vm553_vm0, %v550_v8  ;;  %v1015_v17 = vsel %vm553_vm0, %v933_v4, 0.0  ;;  %v868_v59 = vsel %vm553_vm0, %v1685_v1, 0.0  ;;  %v935_v18 = vmul.f32 %v1706_v13, %v1706_v13  ;;  %v936_v15 = vmul.f32 %v1662_v52, %v1662_v52 }
 0x12c   :  { %v861_v62 = vadd.f32 %v860_v36, %v859_v54  ;;  %v1008_v46 = vadd.f32 %v1007_v22, %v1006_v53  ;;  %v1017_v20 = vsel %vm553_vm0, %v934_v3, 0.0  ;;  %v870_v21 = vsel %vm553_vm0, %v1706_v13, 0.0 }
 0x12d   :  { %v872_v7 = vsel %vm553_vm0, %v1662_v52, 0.0  ;;  %v937_v1 = vmul.f32 %v1704_v26, %v1704_v26  ;;  %v1019_v24 = vsel %vm553_vm0, %v935_v18, 0.0  ;;  %v1021_v33 = vsel %vm553_vm0, %v936_v15, 0.0 }
 0x12e   :  { %v1010_v32 = vadd.f32 %v1009_v63, %v1008_v46  ;;  %v863_v48 = vadd.f32 %v862_v0, %v861_v62  ;;  %v874_v35 = vsel %vm553_vm0, %v1704_v26, 0.0  ;;  %v938_v13 = vmul.f32 %v1738_v29, %v1738_v29 }
 0x12f   :  { %v1023_v45 = vsel %vm553_vm0, %v937_v1, 0.0  ;;  %v876_v52 = vsel %vm553_vm0, %v1738_v29, 0.0  ;;  %v939_v40 = vmul.f32 %v1761_v43, %v1761_v43  ;;  %v940_v55 = vmul.f32 %v1708_v49, %v1708_v49 }
 0x130   :  { %v865_v9 = vadd.f32 %v864_v14, %v863_v48  ;;  %v1012_v10 = vadd.f32 %v1011_v6, %v1010_v32  ;;  %v1025_v26 = vsel %vm553_vm0, %v938_v13, 0.0  ;;  %v878_v42 = vsel %vm553_vm0, %v1761_v43, 0.0 }
 0x131   :  { %v880_v50 = vsel %vm553_vm0, %v1708_v49, 0.0  ;;  %v941_v29 = vmul.f32 %v1740_v30, %v1740_v30  ;;  %v1027_v51 = vsel %vm553_vm0, %v939_v40, 0.0  ;;  %v1029_v53 = vsel %vm553_vm0, %v940_v55, 0.0 }
 0x132   :  { %v1014_v25 = vadd.f32 %v1013_v11, %v1012_v10  ;;  %v867_v16 = vadd.f32 %v866_v12, %v865_v9  ;;  %v882_v54 = vsel %vm553_vm0, %v1740_v30, 0.0  ;;  %v942_v43 = vmul.f32 %v1780_v58, %v1780_v58 }
 0x133   :  { %v1031_v62 = vsel %vm553_vm0, %v941_v29, 0.0  ;;  %v884_v49 = vsel %vm553_vm0, %v1780_v58, 0.0  ;;  %v943_v46 = vmul.f32 %v550_v8, %v550_v8  ;;  %v944_v63 = vmul.f32 %v1778_v57, %v1778_v57 }
 0x134   :  { %v869_v19 = vadd.f32 %v868_v59, %v867_v16  ;;  %v1016_v39 = vadd.f32 %v1015_v17, %v1014_v25  ;;  %v1033_v0 = vsel %vm553_vm0, %v942_v43, 0.0  ;;  %v886_v30 = vsel %vm553_vm0, %v550_v8, 0.0 }
 0x135   :  { %v888_v14 = vsel %vm553_vm0, %v1778_v57, 0.0  ;;  %v945_v4 = vmul.f32 %v1782_v60, %v1782_v60  ;;  %v1035_v58 = vsel %vm553_vm0, %v943_v46, 0.0  ;;  %v1037_v10 = vsel %vm553_vm0, %v944_v63, 0.0 }
 0x136   :  { %v1018_v27 = vadd.f32 %v1017_v20, %v1016_v39  ;;  %v871_v44 = vadd.f32 %v870_v21, %v869_v19  ;;  %v890_v11 = vsel %vm553_vm0, %v1782_v60, 0.0 }
 0x137   :  { %v1039_v8 = vsel %vm553_vm0, %v945_v4, 0.0 }
 0x138   :  { %v873_v28 = vadd.f32 %v872_v7, %v871_v44  ;;  %v1020_v31 = vadd.f32 %v1019_v24, %v1018_v27 }
 0x13a   :  { %v1022_v5 = vadd.f32 %v1021_v33, %v1020_v31  ;;  %v875_v34 = vadd.f32 %v874_v35, %v873_v28 }
 0x13c   :  { %v877_v37 = vadd.f32 %v876_v52, %v875_v34  ;;  %v1024_v23 = vadd.f32 %v1023_v45, %v1022_v5 }
 0x13e   :  { %v1026_v61 = vadd.f32 %v1025_v26, %v1024_v23  ;;  %v879_v47 = vadd.f32 %v878_v42, %v877_v37 }
 0x140   :  { %v881_v2 = vadd.f32 %v880_v50, %v879_v47  ;;  %v1028_v22 = vadd.f32 %v1027_v51, %v1026_v61 }
 0x142   :  { %v1030_v36 = vadd.f32 %v1029_v53, %v1028_v22  ;;  %v883_v56 = vadd.f32 %v882_v54, %v881_v2 }
 0x144   :  { %v885_v41 = vadd.f32 %v884_v49, %v883_v56  ;;  %v1032_v38 = vadd.f32 %v1031_v62, %v1030_v36 }
 0x146   :  { %v1034_v32 = vadd.f32 %v1033_v0, %v1032_v38  ;;  %v887_v48 = vadd.f32 %v886_v30, %v885_v41 }
 0x148   :  { %v889_v6 = vadd.f32 %v888_v14, %v887_v48  ;;  %v1036_v9 = vadd.f32 %v1035_v58, %v1034_v32 }
 0x14a   :  { %v891_v12 = vadd.f32 %v890_v11, %v889_v6  ;;  %v1038_v3 = vadd.f32 %v1037_v10, %v1036_v9 }
 0x14c   :  { %v892_v25 = vrot.slane %v891_v12, 4  ;;  %v1040_v16 = vadd.f32 %v1039_v8, %v1038_v3 }
 0x14e   :  { %v893_v17 = vadd.f32 %v892_v25, %v891_v12  ;;  %v1041_v57 = vrot.slane %v1040_v16, 4 }
 0x150   :  { %v894_v59 = vrot.slane %v893_v17, 2  ;;  %v1042_v18 = vadd.f32 %v1041_v57, %v1040_v16 }
 0x152   :  { %v895_v19 = vadd.f32 %v894_v59, %v893_v17  ;;  %v1043_v39 = vrot.slane %v1042_v18, 2 }
 0x154   :  { %v896_v15 = vrot.slane %v895_v19, 1  ;;  %v1044_v20 = vadd.f32 %v1043_v39, %v1042_v18 }
 0x156   :  { %v1045_v21 = vrot.slane %v1044_v20, 1  ;;  %v897_v27 = vadd.f32 %v896_v15, %v895_v19 }
 0x158   :  { %v1046_v44 = vadd.f32 %v1045_v21, %v1044_v20 }
 0x15a   :  { %v1048_v60 = vsel %vm1047_vm1, %v897_v27, %v1046_v44 }
 0x15b   :  { %1050 = vst.msk [vmem:[%s1882_s4] sm:$0x3] %vm1049_vm2, %v1048_v60 }

// kernel: cnn_encoder_forward.6
= control target key start
LH: loop header
LB: loop body
LE: loop exit
PB: predicated region body
PF: predicated region fallthrough
CT: control target
= control target key end

     0   :  { %vm229_vm0 = vcmask 64512   ;;  %vm363_vm1 = vcmask 1040384   ;;  %vm365_vm2 = vcmask 58368   ;;  %s627_s1 = inlined_call_operand.vmem [shape: bf16[128,8], index: 1, kind: input, shape index: {}]   ;;  %s628_s0 = inlined_call_operand.vmem [shape: bf16[96,128], index: 0, kind: input, shape index: {}]   ;;  %s629_s2 = inlined_call_operand.vmem [shape: f32[1,8], index: 2, kind: input, shape index: {}]   ;;  %s630_s3 = inlined_call_operand.vmem [shape: f32[96,8], index: 3, kind: output, shape index: {0}]   ;;  %s631_s4 = inlined_call_operand.vmem [shape: f32[1,2,8], index: 4, kind: output, shape index: {1}]  }
   0x1   :  { %v448_v0 = vld [vmem:[%s627_s1 + $0x38] sm:$0xff]   ;;  %v449_v1 = vld [vmem:[%s627_s1 + $0x30] sm:$0xff]   ;;  %v450_v2 = vld [vmem:[%s627_s1 + $0x28] sm:$0xff]  }
   0x2   :  { %404 = vmatprep.subr.bf16.mxu0 %v448_v0  ;;  %432 = vmatprep.subr.bf16.mxu1 %v448_v0  ;;  %v451_v3 = vld [vmem:[%s627_s1 + $0x20] sm:$0xff]   ;;  %v458_v5 = vld [vmem:[%s628_s0 + $0x10] sm:$0xff]   ;;  %v452_v6 = vld [vmem:[%s627_s1 + $0x18] sm:$0xff]  }
   0x3   :  { %405 = vmatpush3.bf16.msra.mxu0 %v448_v0  ;;  %440 = vmatpush3.bf16.msra.mxu1 %v448_v0  ;;  %v456_v4 = vld [vmem:[%s628_s0] sm:$0xff]   ;;  %v453_v7 = vld [vmem:[%s627_s1 + $0x10] sm:$0xff]   ;;  %v454_v8 = vld [vmem:[%s627_s1 + $0x8] sm:$0xff]  }
   0x4   :  { %406 = vmatprep.subr.bf16.mxu0 %v449_v1  ;;  %433 = vmatprep.subr.bf16.mxu1 %v449_v1  ;;  %v455_v9 = vld [vmem:[%s627_s1] sm:$0xff]   ;;  %v457_v10 = vld [vmem:[%s628_s0 + $0x8] sm:$0xff]   ;;  %v459_v11 = vld [vmem:[%s628_s0 + $0x18] sm:$0xff]  }
   0x5   :  { %420 = vmatprep.mubr.bf16.mxu0 %v456_v4  ;;  %424 = vmatprep.mubr.bf16.mxu1 %v458_v5  ;;  %v460_v12 = vld [vmem:[%s628_s0 + $0x20] sm:$0xff]   ;;  %v461_v13 = vld [vmem:[%s628_s0 + $0x28] sm:$0xff]  }
   0x6   :  { %v532_v14 = vld [vmem:[%s629_s2] ss:$0 sm:$0xff] }
   0x7   :  { %407 = vmatpush3.bf16.msra.mxu0 %v449_v1  ;;  %441 = vmatpush3.bf16.msra.mxu1 %v449_v1 }
   0x8   :  { %408 = vmatprep.subr.bf16.mxu0 %v450_v2  ;;  %434 = vmatprep.subr.bf16.mxu1 %v450_v2 }
   0xb   :  { %409 = vmatpush3.bf16.msra.mxu0 %v450_v2  ;;  %442 = vmatpush3.bf16.msra.mxu1 %v450_v2 }
   0xc   :  { %410 = vmatprep.subr.bf16.mxu0 %v451_v3  ;;  %435 = vmatprep.subr.bf16.mxu1 %v451_v3 }
   0xf   :  { %411 = vmatpush3.bf16.msra.mxu0 %v451_v3  ;;  %443 = vmatpush3.bf16.msra.mxu1 %v451_v3 }
  0x10   :  { %412 = vmatprep.subr.bf16.mxu0 %v452_v6  ;;  %436 = vmatprep.subr.bf16.mxu1 %v452_v6 }
  0x13   :  { %413 = vmatpush3.bf16.msra.mxu0 %v452_v6  ;;  %444 = vmatpush3.bf16.msra.mxu1 %v452_v6 }
  0x14   :  { %414 = vmatprep.subr.bf16.mxu0 %v453_v7  ;;  %437 = vmatprep.subr.bf16.mxu1 %v453_v7 }
  0x17   :  { %415 = vmatpush3.bf16.msra.mxu0 %v453_v7  ;;  %445 = vmatpush3.bf16.msra.mxu1 %v453_v7 }
  0x18   :  { %416 = vmatprep.subr.bf16.mxu0 %v454_v8  ;;  %438 = vmatprep.subr.bf16.mxu1 %v454_v8 }
  0x1b   :  { %417 = vmatpush3.bf16.msra.mxu0 %v454_v8  ;;  %446 = vmatpush3.bf16.msra.mxu1 %v454_v8 }
  0x1c   :  { %418 = vmatprep.subr.bf16.mxu0 %v455_v9  ;;  %439 = vmatprep.subr.bf16.mxu1 %v455_v9 }
  0x1f   :  { %419 = vmatpush3.bf16.msra.mxu0 %v455_v9  ;;  %447 = vmatpush3.bf16.msra.mxu1 %v455_v9 }
  0x22   :  { %421 = vmatmul.mubr.bf16.vlgmr.msra.gmra.mxu0 %v457_v10  ;;  %425 = vmatmul.mubr.bf16.vlgmr.msra.gmra.mxu1 %v459_v11 }
  0x23   :  { %428 = vmatprep.mubr.bf16.mxu1 %v460_v12 }
  0x2a   :  { %429 = vmatmul.mubr.bf16.gmra.mxu1 %v461_v13 }
  0xe2   :  { %v422_v15 = vpop.f32.mrf.mxu0  ;;  %v426_v16 = vpop.f32.mrf.mxu1 }
  0xe3   :  { %v179_v17 = vadd.f32 %v422_v15, %v532_v14  ;;  %v195_v18 = vadd.f32 %v426_v16, %v532_v14 }
  0xe4   :  { %v170_v19 = vpop.f32.mrf.mxu0  ;;  %v186_v20 = vpop.f32.mrf.mxu1 }
  0xe5   :  { %v219_v21 = vmax.f32 %v179_v17, 0.0  ;;  %v171_v22 = vadd.f32 %v532_v14, %v170_v19  ;;  %v537_v23 = vmax.f32 %v195_v18, 0.0  ;;  %v187_v24 = vadd.f32 %v532_v14, %v186_v20 }
  0xe6   :  { %v423_v25 = vpop.f32.mrf.mxu0  ;;  %v427_v26 = vpop.f32.mrf.mxu1 }
  0xe7   :  { %232 = vst.msk [vmem:[%s630_s3 + $0x10] sm:$0xff] %vm229_vm0, %v219_v21  ;;  %v217_v27 = vmax.f32 %v171_v22, 0.0  ;;  %236 = vst.msk [vmem:[%s630_s3 + $0x30] sm:$0xff] %vm229_vm0, %v537_v23  ;;  %v182_v28 = vadd.f32 %v423_v25, %v532_v14  ;;  %v221_v29 = vmax.f32 %v187_v24, 0.0  ;;  %v198_v31 = vadd.f32 %v427_v26, %v532_v14 }
  0xe8   :  { %v173_v30 = vpop.f32.mrf.mxu0  ;;  %v189_v32 = vpop.f32.mrf.mxu1  ;;  %v324_v40 = vmul.f32 %v219_v21, %v219_v21  ;;  %v296_v43 = vsel %vm229_vm0, %v219_v21, 0.0  ;;  %v328_v9 = vmul.f32 %v537_v23, %v537_v23 }
  0xe9   :  { %230 = vst.msk [vmem:[%s630_s3] sm:$0xff] %vm229_vm0, %v217_v27  ;;  %v174_v33 = vadd.f32 %v532_v14, %v173_v30  ;;  %v322_v34 = vmul.f32 %v217_v27, %v217_v27  ;;  %v220_v35 = vmax.f32 %v182_v28, 0.0  ;;  %234 = vst.msk [vmem:[%s630_s3 + $0x20] sm:$0xff] %vm229_vm0, %v221_v29  ;;  %v224_v38 = vmax.f32 %v198_v31, 0.0 }
  0xea   :  { %v430_v36 = vpop.f32.mrf.mxu1  ;;  %v190_v39 = vadd.f32 %v532_v14, %v189_v32  ;;  %v293_v44 = vsel %vm229_vm0, %v217_v27, 0.0  ;;  %v337_v56 = vsel %vm229_vm0, %v324_v40, 0.0  ;;  %v326_v61 = vmul.f32 %v221_v29, %v221_v29 }
  0xeb   :  { %v218_v37 = vmax.f32 %v174_v33, 0.0  ;;  %233 = vst.msk [vmem:[%s630_s3 + $0x18] sm:$0xff] %vm229_vm0, %v220_v35  ;;  %v211_v41 = vadd.f32 %v430_v36, %v532_v14  ;;  %237 = vst.msk [vmem:[%s630_s3 + $0x38] sm:$0xff] %vm229_vm0, %v224_v38  ;;  %v334_v47 = vsel %vm229_vm0, %v322_v34, 0.0  ;;  %v325_v52 = vmul.f32 %v220_v35, %v220_v35 }
  0xec   :  { %v202_v42 = vpop.f32.mrf.mxu1  ;;  %v222_v49 = vmax.f32 %v190_v39, 0.0  ;;  %v298_v60 = vsel %vm229_vm0, %v220_v35, 0.0  ;;  %v300_v4 = vsel %vm229_vm0, %v221_v29, 0.0  ;;  %v341_v10 = vsel %vm229_vm0, %v326_v61, 0.0 }
  0xed   :  { %231 = vst.msk [vmem:[%s630_s3 + $0x8] sm:$0xff] %vm229_vm0, %v218_v37  ;;  %v294_v45 = vsel %vm229_vm0, %v218_v37, 0.0  ;;  %v323_v46 = vmul.f32 %v218_v37, %v218_v37  ;;  %v227_v50 = vmax.f32 %v211_v41, 0.0  ;;  %v203_v54 = vadd.f32 %v532_v14, %v202_v42 }
  0xee   :  { %v295_v48 = vadd.f32 %v294_v45, %v293_v44  ;;  %v431_v51 = vpop.f32.mrf.mxu1  ;;  %235 = vst.msk [vmem:[%s630_s3 + $0x28] sm:$0xff] %vm229_vm0, %v222_v49  ;;  %v339_v3 = vsel %vm229_vm0, %v325_v52, 0.0  ;;  %v327_v5 = vmul.f32 %v222_v49, %v222_v49  ;;  %v302_v11 = vsel %vm229_vm0, %v222_v49, 0.0 }
  0xef   :  { %v335_v53 = vsel %vm229_vm0, %v323_v46, 0.0  ;;  %v214_v55 = vadd.f32 %v431_v51, %v532_v14  ;;  %240 = vst.msk [vmem:[%s630_s3 + $0x50] sm:$0xff] %vm229_vm0, %v227_v50  ;;  %v225_v62 = vmax.f32 %v203_v54, 0.0  ;;  %v329_v15 = vmul.f32 %v224_v38, %v224_v38 }
  0xf0   :  { %v297_v57 = vadd.f32 %v296_v43, %v295_v48  ;;  %v336_v58 = vadd.f32 %v335_v53, %v334_v47  ;;  %v205_v59 = vpop.f32.mrf.mxu1  ;;  %v343_v16 = vsel %vm229_vm0, %v327_v5, 0.0  ;;  %v345_v19 = vsel %vm229_vm0, %v328_v9, 0.0 }
  0xf1   :  { %v228_v63 = vmax.f32 %v214_v55, 0.0  ;;  %v206_v2 = vadd.f32 %v532_v14, %v205_v59  ;;  %238 = vst.msk [vmem:[%s630_s3 + $0x40] sm:$0xff] %vm229_vm0, %v225_v62  ;;  %v304_v14 = vsel %vm229_vm0, %v537_v23, 0.0  ;;  %v306_v20 = vsel %vm229_vm0, %v224_v38, 0.0 }
  0xf2   :  { %v338_v0 = vadd.f32 %v337_v56, %v336_v58  ;;  %v299_v1 = vadd.f32 %v298_v60, %v297_v57  ;;  %v330_v21 = vmul.f32 %v225_v62, %v225_v62  ;;  %v347_v25 = vsel %vm229_vm0, %v329_v15, 0.0 }
  0xf3   :  { %241 = vst.msk [vmem:[%s630_s3 + $0x58] sm:$0xff] %vm229_vm0, %v228_v63  ;;  %v226_v8 = vmax.f32 %v206_v2, 0.0  ;;  %v308_v26 = vsel %vm229_vm0, %v225_v62, 0.0  ;;  %v332_v23 = vmul.f32 %v227_v50, %v227_v50  ;;  %v312_v34 = vsel %vm229_vm0, %v227_v50, 0.0 }
  0xf4   :  { %v301_v6 = vadd.f32 %v300_v4, %v299_v1  ;;  %v340_v7 = vadd.f32 %v339_v3, %v338_v0  ;;  %v349_v30 = vsel %vm229_vm0, %v330_v21, 0.0  ;;  %v333_v35 = vmul.f32 %v228_v63, %v228_v63 }
  0xf5   :  { %239 = vst.msk [vmem:[%s630_s3 + $0x48] sm:$0xff] %vm229_vm0, %v226_v8  ;;  %v331_v27 = vmul.f32 %v226_v8, %v226_v8  ;;  %v310_v31 = vsel %vm229_vm0, %v226_v8, 0.0  ;;  %v353_v39 = vsel %vm229_vm0, %v332_v23, 0.0  ;;  %v314_v40 = vsel %vm229_vm0, %v228_v63, 0.0 }
  0xf6   :  { %v303_v12 = vadd.f32 %v302_v11, %v301_v6  ;;  %v342_v13 = vadd.f32 %v341_v10, %v340_v7  ;;  %v355_v43 = vsel %vm229_vm0, %v333_v35, 0.0 }
  0xf7   :  { %v351_v36 = vsel %vm229_vm0, %v331_v27, 0.0 }
  0xf8   :  { %v305_v17 = vadd.f32 %v304_v14, %v303_v12  ;;  %v344_v18 = vadd.f32 %v343_v16, %v342_v13 }
  0xfa   :  { %v346_v22 = vadd.f32 %v345_v19, %v344_v18  ;;  %v307_v24 = vadd.f32 %v306_v20, %v305_v17 }
  0xfc   :  { %v309_v28 = vadd.f32 %v308_v26, %v307_v24  ;;  %v348_v29 = vadd.f32 %v347_v25, %v346_v22 }
  0xfe   :  { %v350_v32 = vadd.f32 %v349_v30, %v348_v29  ;;  %v311_v33 = vadd.f32 %v310_v31, %v309_v28 }
 0x100   :  { %v313_v37 = vadd.f32 %v312_v34, %v311_v33  ;;  %v352_v38 = vadd.f32 %v351_v36, %v350_v32 }
 0x102   :  { %v315_v41 = vadd.f32 %v314_v40, %v313_v37  ;;  %v354_v42 = vadd.f32 %v353_v39, %v352_v38 }
 0x104   :  { %v316_v44 = vrot.slane %v315_v41, 4  ;;  %v356_v45 = vadd.f32 %v355_v43, %v354_v42 }
 0x106   :  { %v317_v46 = vadd.f32 %v316_v44, %v315_v41  ;;  %v357_v47 = vrot.slane %v356_v45, 4 }
 0x108   :  { %v318_v48 = vrot.slane %v317_v46, 2  ;;  %v358_v49 = vadd.f32 %v357_v47, %v356_v45 }
 0x10a   :  { %v319_v50 = vadd.f32 %v318_v48, %v317_v46  ;;  %v359_v51 = vrot.slane %v358_v49, 2 }
 0x10c   :  { %v320_v52 = vrot.slane %v319_v50, 1  ;;  %v360_v53 = vadd.f32 %v359_v51, %v358_v49 }
 0x10e   :  { %v361_v54 = vrot.slane %v360_v53, 1  ;;  %v321_v55 = vadd.f32 %v320_v52, %v319_v50 }
 0x110   :  { %v362_v56 = vadd.f32 %v361_v54, %v360_v53 }
 0x112   :  { %v364_v57 = vsel %vm363_vm1, %v321_v55, %v362_v56 }
 0x113   :  { %366 = vst.msk [vmem:[%s631_s4] sm:$0x3] %vm365_vm2, %v364_v57 }

// kernel: cnn_encoder_forward.7
= control target key start
LH: loop header
LB: loop body
LE: loop exit
PB: predicated region body
PF: predicated region fallthrough
CT: control target
= control target key end

     0   :  { %vm229_vm0 = vcmask 130048   ;;  %vm283_vm1 = vcmask 1040384   ;;  %vm285_vm2 = vcmask 123904   ;;  %s495_s1 = inlined_call_operand.vmem [shape: bf16[256,16], index: 1, kind: input, shape index: {}]   ;;  %s496_s0 = inlined_call_operand.vmem [shape: bf16[32,256], index: 0, kind: input, shape index: {}]   ;;  %s497_s2 = inlined_call_operand.vmem [shape: f32[1,16], index: 2, kind: input, shape index: {}]   ;;  %s498_s3 = inlined_call_operand.vmem [shape: f32[32,16], index: 3, kind: output, shape index: {0}]   ;;  %s499_s4 = inlined_call_operand.vmem [shape: f32[1,2,16], index: 4, kind: output, shape index: {1}]  }
   0x1   :  { %v360_v0 = vld [vmem:[%s495_s1 + $0x78] sm:$0xff]   ;;  %v362_v2 = vld [vmem:[%s495_s1 + $0x70] sm:$0xff]   ;;  %v364_v4 = vld [vmem:[%s495_s1 + $0x68] sm:$0xff]  }
   0x2   :  { %v361_v1 = vld [vmem:[%s495_s1 + $0x38] sm:$0xff]   ;;  %316 = vmatprep.subr.bf16.mxu0 %v360_v0  ;;  %344 = vmatprep.subr.bf16.mxu1 %v360_v0  ;;  %v363_v3 = vld [vmem:[%s495_s1 + $0x30] sm:$0xff]   ;;  %v365_v5 = vld [vmem:[%s495_s1 + $0x28] sm:$0xff]  }
   0x3   :  { %317 = vmatpush3.bf16.msra.mxu0 %v361_v1  ;;  %352 = vmatpush3.bf16.msra.mxu1 %v361_v1  ;;  %v366_v6 = vld [vmem:[%s495_s1 + $0x60] sm:$0xff]   ;;  %v368_v8 = vld [vmem:[%s495_s1 + $0x58] sm:$0xff]   ;;  %v370_v10 = vld [vmem:[%s495_s1 + $0x50] sm:$0xff]  }
   0x4   :  { %318 = vmatprep.subr.bf16.mxu0 %v362_v2  ;;  %345 = vmatprep.subr.bf16.mxu1 %v362_v2  ;;  %v367_v7 = vld [vmem:[%s495_s1 + $0x20] sm:$0xff]   ;;  %v369_v9 = vld [vmem:[%s495_s1 + $0x18] sm:$0xff]   ;;  %v371_v13 = vld [vmem:[%s495_s1 + $0x10] sm:$0xff]  }
   0x5   :  { %v378_v11 = vld [vmem:[%s496_s0 + $0x4] ss:$8 sps:$4 sm:$0xff]   ;;  %v381_v12 = vld [vmem:[%s496_s0 + $0x14] ss:$8 sps:$4 sm:$0xff]   ;;  %v376_v18 = vld [vmem:[%s496_s0] ss:$8 sps:$4 sm:$0xff]  }
   0x6   :  { %v372_v14 = vld [vmem:[%s495_s1 + $0x48] sm:$0xff]   ;;  %208 = vmatprep.mubr.bf16.mxu0 %v378_v11  ;;  %216 = vmatprep.mubr.bf16.mxu1 %v381_v12  ;;  %v374_v16 = vld [vmem:[%s495_s1 + $0x40] sm:$0xff]   ;;  %v379_v19 = vld [vmem:[%s496_s0 + $0x10] ss:$8 sps:$4 sm:$0xff]  }
   0x7   :  { %319 = vmatpush3.bf16.msra.mxu0 %v363_v3  ;;  %353 = vmatpush3.bf16.msra.mxu1 %v363_v3  ;;  %v373_v15 = vld [vmem:[%s495_s1 + $0x8] sm:$0xff]   ;;  %v375_v17 = vld [vmem:[%s495_s1] sm:$0xff]  }
   0x8   :  { %320 = vmatprep.subr.bf16.mxu0 %v364_v4  ;;  %346 = vmatprep.subr.bf16.mxu1 %v364_v4  ;;  %v295_v22 = vld [vmem:[%s497_s2] ss:$0 sm:$0xff] }
   0xb   :  { %321 = vmatpush3.bf16.msra.mxu0 %v365_v5  ;;  %354 = vmatpush3.bf16.msra.mxu1 %v365_v5 }
   0xc   :  { %322 = vmatprep.subr.bf16.mxu0 %v366_v6  ;;  %347 = vmatprep.subr.bf16.mxu1 %v366_v6 }
   0xf   :  { %323 = vmatpush3.bf16.msra.mxu0 %v367_v7  ;;  %355 = vmatpush3.bf16.msra.mxu1 %v367_v7 }
  0x10   :  { %324 = vmatprep.subr.bf16.mxu0 %v368_v8  ;;  %348 = vmatprep.subr.bf16.mxu1 %v368_v8 }
  0x13   :  { %325 = vmatpush3.bf16.msra.mxu0 %v369_v9  ;;  %356 = vmatpush3.bf16.msra.mxu1 %v369_v9 }
  0x14   :  { %326 = vmatprep.subr.bf16.mxu0 %v370_v10  ;;  %349 = vmatprep.subr.bf16.mxu1 %v370_v10 }
  0x17   :  { %327 = vmatpush3.bf16.msra.mxu0 %v371_v13  ;;  %357 = vmatpush3.bf16.msra.mxu1 %v371_v13 }
  0x18   :  { %328 = vmatprep.subr.bf16.mxu0 %v372_v14  ;;  %350 = vmatprep.subr.bf16.mxu1 %v372_v14 }
  0x1b   :  { %329 = vmatpush3.bf16.msra.mxu0 %v373_v15  ;;  %358 = vmatpush3.bf16.msra.mxu1 %v373_v15 }
  0x1c   :  { %330 = vmatprep.subr.bf16.mxu0 %v374_v16  ;;  %351 = vmatprep.subr.bf16.mxu1 %v374_v16 }
  0x1f   :  { %331 = vmatpush3.bf16.msra.mxu0 %v375_v17  ;;  %359 = vmatpush3.bf16.msra.mxu1 %v375_v17 }
  0x22   :  { %209 = vmatmul.mubr.bf16.vlgmr.msra.gmra.mxu0 %v376_v18  ;;  %217 = vmatmul.mubr.bf16.vlgmr.msra.gmra.mxu1 %v379_v19 }
  0xe2   :  { %v332_v20 = vpop.f32.mrf.mxu0  ;;  %v338_v21 = vpop.f32.mrf.mxu1 }
  0xe4   :  { %v333_v23 = vpop.f32.mrf.mxu0  ;;  %v339_v24 = vpop.f32.mrf.mxu1 }
  0xe5   :  { %v334_v25 = vadd.f32 %v333_v23, %v332_v20  ;;  %v340_v26 = vadd.f32 %v339_v24, %v338_v21 }
  0xe6   :  { %v335_v27 = vpop.f32.mrf.mxu0  ;;  %v341_v28 = vpop.f32.mrf.mxu1 }
  0xe7   :  { %v211_v29 = vadd.f32 %v334_v25, %v295_v22  ;;  %v219_v30 = vadd.f32 %v340_v26, %v295_v22 }
  0xe8   :  { %v336_v31 = vpop.f32.mrf.mxu0  ;;  %v342_v32 = vpop.f32.mrf.mxu1 }
  0xe9   :  { %v225_v33 = vmax.f32 %v211_v29, 0.0  ;;  %v227_v34 = vmax.f32 %v219_v30, 0.0  ;;  %v337_v35 = vadd.f32 %v336_v31, %v335_v27  ;;  %v343_v36 = vadd.f32 %v342_v32, %v341_v28 }
  0xeb   :  { %230 = vst.msk [vmem:[%s498_s3] sm:$0xff] %vm229_vm0, %v225_v33  ;;  %232 = vst.msk [vmem:[%s498_s3 + $0x10] sm:$0xff] %vm229_vm0, %v227_v34  ;;  %v214_v37 = vadd.f32 %v337_v35, %v295_v22  ;;  %v222_v38 = vadd.f32 %v343_v36, %v295_v22  ;;  %v266_v39 = vmul.f32 %v225_v33, %v225_v33  ;;  %v253_v42 = vsel %vm229_vm0, %v225_v33, 0.0 }
  0xec   :  { %v268_v43 = vmul.f32 %v227_v34, %v227_v34  ;;  %v256_v48 = vsel %vm229_vm0, %v227_v34, 0.0 }
  0xed   :  { %v226_v40 = vmax.f32 %v214_v37, 0.0  ;;  %v228_v41 = vmax.f32 %v222_v38, 0.0  ;;  %v270_v47 = vsel %vm229_vm0, %v266_v39, 0.0 }
  0xee   :  { %v273_v52 = vsel %vm229_vm0, %v268_v43, 0.0 }
  0xef   :  { %231 = vst.msk [vmem:[%s498_s3 + $0x8] sm:$0xff] %vm229_vm0, %v226_v40  ;;  %v254_v44 = vsel %vm229_vm0, %v226_v40, 0.0  ;;  %v267_v45 = vmul.f32 %v226_v40, %v226_v40  ;;  %233 = vst.msk [vmem:[%s498_s3 + $0x18] sm:$0xff] %vm229_vm0, %v228_v41 }
  0xf0   :  { %v255_v46 = vadd.f32 %v254_v44, %v253_v42 }
  0xf1   :  { %v271_v49 = vsel %vm229_vm0, %v267_v45, 0.0 }
  0xf2   :  { %v257_v50 = vadd.f32 %v256_v48, %v255_v46  ;;  %v272_v51 = vadd.f32 %v271_v49, %v270_v47 }
  0xf4   :  { %v260_v53 = vrot.slane %v257_v50, 4  ;;  %v274_v54 = vadd.f32 %v273_v52, %v272_v51 }
  0xf6   :  { %v261_v55 = vadd.f32 %v260_v53, %v257_v50  ;;  %v277_v56 = vrot.slane %v274_v54, 4 }
  0xf8   :  { %v262_v57 = vrot.slane %v261_v55, 2  ;;  %v278_v58 = vadd.f32 %v277_v56, %v274_v54 }
  0xfa   :  { %v263_v59 = vadd.f32 %v262_v57, %v261_v55  ;;  %v279_v60 = vrot.slane %v278_v58, 2 }
  0xfc   :  { %v264_v61 = vrot.slane %v263_v59, 1  ;;  %v280_v62 = vadd.f32 %v279_v60, %v278_v58 }
  0xfe   :  { %v281_v63 = vrot.slane %v280_v62, 1  ;;  %v265_v0 = vadd.f32 %v264_v61, %v263_v59 }
 0x100   :  { %v282_v1 = vadd.f32 %v281_v63, %v280_v62 }
 0x102   :  { %v284_v2 = vsel %vm283_vm1, %v265_v0, %v282_v1 }
 0x103   :  { %286 = vst.msk [vmem:[%s499_s4] sm:$0x3] %vm285_vm2, %v284_v2 }

// kernel: cnn_encoder_forward.8
= control target key start
LH: loop header
LB: loop body
LE: loop exit
PB: predicated region body
PF: predicated region fallthrough
CT: control target
= control target key end

     0   :  { %v235_v0 = vmov 0.0   ;;  %vm236_vm0 = vmmov 0   ;;  %v142_v10 = vlaneseq  ;;  %vm139_vm1 = vcmask 261120   ;;  %s305_s1 = inlined_call_operand.vmem [shape: bf16[128,32], index: 1, kind: input, shape index: {}]   ;;  %s306_s0 = inlined_call_operand.vmem [shape: bf16[16,128], index: 0, kind: input, shape index: {}]   ;;  %s307_s2 = inlined_call_operand.vmem [shape: f32[1,32], index: 2, kind: input, shape index: {}]   ;;  %s308_s3 = inlined_call_operand.vmem [shape: f32[16,32], index: 3, kind: output, shape index: {0}]   ;;  %s309_s4 = inlined_call_operand.vmem [shape: f32[1,2,32], index: 4, kind: output, shape index: {1}]  }
   0x1   :  { %204 = vmatprep.subr.bf16.mxu0 %v235_v0  ;;  %v226_v1 = vld [vmem:[%s305_s1 + $0x38] sm:$0xff]   ;;  %220 = vmatprep.mubr.msk.bf16.mxu0 %vm236_vm0, %v235_v0  ;;  %v227_v2 = vld [vmem:[%s305_s1 + $0x30] sm:$0xff]   ;;  %v228_v3 = vld [vmem:[%s305_s1 + $0x28] sm:$0xff]   ;;  %vm173_vm3 = vcmask 1040384   ;;  %vm175_vm4 = vcmask 254976  }
   0x2   :  { %205 = vmatpush3.bf16.msra.mxu0 %v226_v1  ;;  %v229_v4 = vld [vmem:[%s305_s1 + $0x20] sm:$0xff]   ;;  %v230_v5 = vld [vmem:[%s305_s1 + $0x18] sm:$0xff]   ;;  %v231_v6 = vld [vmem:[%s305_s1 + $0x10] sm:$0xff]   ;;  %v143_v12 = vshrl.u32 %v142_v10, 7 }
   0x3   :  { %206 = vmatprep.subr.bf16.mxu0 %v235_v0  ;;  %v232_v7 = vld [vmem:[%s305_s1 + $0x8] sm:$0xff]   ;;  %v233_v8 = vld [vmem:[%s305_s1] sm:$0xff]  }
   0x4   :  { %v234_v9 = vld [vmem:[%s306_s0] sm:$0xff]   ;;  %vm149_vm2 = vcmp.lt.s32.totalorder %v143_v12, 6 }
   0x5   :  { %v185_v11 = vld [vmem:[%s307_s2] ss:$0 sm:$0xff] }
   0x6   :  { %207 = vmatpush3.bf16.msra.mxu0 %v227_v2 }
   0x7   :  { %208 = vmatprep.subr.bf16.mxu0 %v235_v0 }
   0xa   :  { %209 = vmatpush3.bf16.msra.mxu0 %v228_v3 }
   0xb   :  { %210 = vmatprep.subr.bf16.mxu0 %v235_v0 }
   0xe   :  { %211 = vmatpush3.bf16.msra.mxu0 %v229_v4 }
   0xf   :  { %212 = vmatprep.subr.bf16.mxu0 %v235_v0 }
  0x12   :  { %213 = vmatpush3.bf16.msra.mxu0 %v230_v5 }
  0x13   :  { %214 = vmatprep.subr.bf16.mxu0 %v235_v0 }
  0x16   :  { %215 = vmatpush3.bf16.msra.mxu0 %v231_v6 }
  0x17   :  { %216 = vmatprep.subr.bf16.mxu0 %v235_v0 }
  0x1a   :  { %217 = vmatpush3.bf16.msra.mxu0 %v232_v7 }
  0x1b   :  { %218 = vmatprep.subr.bf16.mxu0 %v235_v0 }
  0x1e   :  { %219 = vmatpush3.bf16.msra.mxu0 %v233_v8 }
  0x21   :  { %221 = vmatmul.mubr.bf16.vlgmr.msra.gmra.mxu0 %v234_v9 }
  0xe1   :  { %v130_v13 = vpop.f32.mrf.mxu0 }
  0xe2   :  { %v131_v14 = vadd.f32 %v185_v11, %v130_v13 }
  0xe3   :  { %v222_v15 = vpop.f32.mrf.mxu0 }
  0xe4   :  { %v137_v16 = vmax.f32 %v131_v14, 0.0 }
  0xe5   :  { %v133_v17 = vpop.f32.mrf.mxu0 }
  0xe6   :  { %140 = vst.msk [vmem:[%s308_s3] sm:$0xff] %vm139_vm1, %v137_v16  ;;  %v151_v18 = vsel %vm149_vm2, %v137_v16, 0.0  ;;  %v134_v19 = vadd.f32 %v185_v11, %v133_v17 }
  0xe7   :  { %v153_v20 = vsel %vm139_vm1, %v151_v18, 0.0  ;;  %v162_v21 = vmul.f32 %v151_v18, %v151_v18  ;;  %v223_v22 = vpop.f32.mrf.mxu0 }
  0xe8   :  { %v156_v23 = vrot.slane %v153_v20, 4  ;;  %v138_v24 = vmax.f32 %v134_v19, 0.0 }
  0xe9   :  { %v164_v25 = vsel %vm139_vm1, %v162_v21, 0.0 }
  0xea   :  { %v157_v26 = vadd.f32 %v156_v23, %v153_v20  ;;  %v167_v27 = vrot.slane %v164_v25, 4  ;;  %141 = vst.msk [vmem:[%s308_s3 + $0x8] sm:$0xff] %vm139_vm1, %v138_v24 }
  0xec   :  { %v158_v28 = vrot.slane %v157_v26, 2  ;;  %v168_v29 = vadd.f32 %v167_v27, %v164_v25 }
  0xee   :  { %v159_v30 = vadd.f32 %v158_v28, %v157_v26  ;;  %v169_v31 = vrot.slane %v168_v29, 2 }
  0xf0   :  { %v160_v32 = vrot.slane %v159_v30, 1  ;;  %v170_v33 = vadd.f32 %v169_v31, %v168_v29 }
  0xf2   :  { %v171_v34 = vrot.slane %v170_v33, 1  ;;  %v161_v35 = vadd.f32 %v160_v32, %v159_v30 }
  0xf4   :  { %v172_v36 = vadd.f32 %v171_v34, %v170_v33 }
  0xf6   :  { %v174_v37 = vsel %vm173_vm3, %v161_v35, %v172_v36 }
  0xf7   :  { %176 = vst.msk [vmem:[%s309_s4] sm:$0x3] %vm175_vm4, %v174_v37 }

// kernel: cnn_encoder_forward.9
= control target key start
LH: loop header
LB: loop body
LE: loop exit
PB: predicated region body
PF: predicated region fallthrough
CT: control target
= control target key end

     0   :  { %v118_v0 = vmov 0.0   ;;  %vm119_vm0 = vmmov 0   ;;  %vm45_vm1 = vcmask 261120   ;;  %vm90_vm2 = vcmask 64512   ;;  %s158_s1 = inlined_call_operand.vmem [shape: bf16[32,8], index: 1, kind: input, shape index: {}]   ;;  %s159_s0 = inlined_call_operand.vmem [shape: bf16[16,32], index: 0, kind: input, shape index: {}]   ;;  %s160_s2 = inlined_call_operand.vmem [shape: f32[1,8], index: 2, kind: input, shape index: {}]   ;;  %s161_s3 = inlined_call_operand.vmem [shape: f32[16,8], index: 3, kind: output, shape index: {}]  }
   0x1   :  { %105 = vmatprep.subr.bf16.mxu0 %v118_v0  ;;  %v115_v1 = vld [vmem:[%s158_s1 + $0x8] sm:$0xff]   ;;  %109 = vmatprep.mubr.msk.bf16.mxu0 %vm119_vm0, %v118_v0  ;;  %v116_v2 = vld [vmem:[%s158_s1] sm:$0xff]  }
   0x2   :  { %106 = vmatpush3.bf16.msra.mxu0 %v115_v1  ;;  %v117_v3 = vld [vmem:[%s159_s0] sm:$0xff]  }
   0x3   :  { %107 = vmatprep.subr.bf16.mxu0 %v118_v0  ;;  %v97_v4 = vld [vmem:[%s160_s2] ss:$0 sm:$0xff] }
   0x6   :  { %108 = vmatpush3.bf16.msra.mxu0 %v116_v2 }
   0x9   :  { %110 = vmatmul.mubr.msk.bf16.vlgmr.msra.gmra.mxu0 %vm45_vm1, %v117_v3 }
  0xc9   :  { %v83_v5 = vpop.f32.mrf.mxu0 }
  0xca   :  { %v84_v6 = vadd.f32 %v97_v4, %v83_v5 }
  0xcb   :  { %v111_v7 = vpop.f32.mrf.mxu0 }
  0xcc   :  { %91 = vst.msk [vmem:[%s161_s3] sm:$0xff] %vm90_vm2, %v84_v6 }
  0xcd   :  { %v86_v8 = vpop.f32.mrf.mxu0 }
  0xce   :  { %v87_v9 = vadd.f32 %v97_v4, %v86_v8 }
  0xcf   :  { %v112_v10 = vpop.f32.mrf.mxu0 }
  0xd0   :  { %92 = vst.msk [vmem:[%s161_s3 + $0x8] sm:$0xff] %vm90_vm2, %v87_v9 }

</bundles_post_ra>
